<compile_context>
chip_gen: v5e
topology: v5e:2x2
jax: 0.10.0
libtpu: 0.0.40
codegen_flags: <defaults>
</compile_context>

<pallas_src>
import functools

import jax
import jax.numpy as jnp
from jax.experimental import pallas as pl
from jax.experimental.pallas import tpu as pltpu

_LANE = 128


# ----------------------------------------------------------------------------
# Fused VQ kernel (everything lane-dense on the pixel axis T)
#   e2h_ref : (K, 1)  0.5 * ||e_k||^2, precomputed in the wrapper
#   e_ref   : (K, D)  codebook
#   et_ref  : (D, K)  codebook transposed
#   zt_ref  : (D, T)  input tile, pixels on the lane axis
# outputs:
#   zq_ref  : (D, T)  straight-through z_q tile
#   idx_ref : (1, T)  int32 nearest codebook index per pixel
#   sse_ref : (1, T)  per-pixel sum_d (z - z_q)^2   (reduced to a scalar outside)
# ----------------------------------------------------------------------------
def _vq_kernel(e2h_ref, e_ref, et_ref, zt_ref, zq_ref, idx_ref, sse_ref):
    e2h = e2h_ref[...]                                   # (K, 1)
    e = e_ref[...]                                       # (K, D)
    et = et_ref[...]                                     # (D, K)
    zt = zt_ref[...]                                     # (D, T)
    num_k = e.shape[0]

    # score[k, m] = 0.5*||e_k||^2 - e_k . z_m   (argmin-equivalent to ||z_m - e_k||^2)
    cross = jnp.dot(e, zt, preferred_element_type=jnp.float32,
                    precision=jax.lax.Precision.HIGHEST)          # (K, T) on MXU
    score = e2h - cross                                           # (K, T)

    # argmin over the codebook axis with first-occurrence tie-breaking
    smin = jnp.min(score, axis=0, keepdims=True)                  # (1, T)
    kiota = jax.lax.broadcasted_iota(jnp.int32, score.shape, 0)   # (K, T)
    idx = jnp.min(jnp.where(score <= smin, kiota, num_k),
                  axis=0, keepdims=True)                          # (1, T) int32

    # codebook lookup via one-hot matmul on the MXU (exactly one 1 per column)
    onehot = (kiota == idx).astype(jnp.float32)                   # (K, T)
    zq = jnp.dot(et, onehot, preferred_element_type=jnp.float32,
                 precision=jax.lax.Precision.HIGHEST)             # (D, T)

    diff = zq - zt                                                # (D, T)
    zq_ref[...] = zt + diff           # straight-through forward value (matches torch)
    idx_ref[...] = idx
    sse_ref[...] = jnp.sum(diff * diff, axis=0, keepdims=True)    # (1, T)


# ----------------------------------------------------------------------------
# Tile / VMEM planning
# ----------------------------------------------------------------------------
def _choose_hw_tile(hw, k, n_batch):
    """Pick the pixel-tile width T and the (possibly padded) H*W extent."""
    # Largest live intermediates per step are the (K, T) f32 score/one-hot tiles:
    # target ~2 MiB each so everything stays well under the 16/32 MiB default scoped
    # VMEM limits (and far under v7x's 64 MiB physical VMEM).
    cap = (2 * 1024 * 1024) // (4 * max(k, 1))
    cap = max(_LANE, min(4096, (cap // _LANE) * _LANE))
    # With a single batch element, make sure the grid still has >= 2 points so
    # dimension_semantics="parallel" can use both v7x TensorCores.
    if n_batch == 1 and hw >= 1024:
        cap = min(cap, max(_LANE, ((hw // 2) // _LANE) * _LANE))
    if hw <= cap:
        return hw, hw                      # one full-extent tile per batch element
    # Prefer a multiple-of-128 divisor of hw (no padding needed).
    t = cap
    while t >= _LANE:
        if hw % t == 0:
            return t, hw
        t -= _LANE
    # Awkward hw: pad up to a multiple of the cap; the tail is sliced off outside.
    hw_pad = -(-hw // cap) * cap
    return cap, hw_pad


def _vmem_limit_bytes(k, d, t):
    pad8 = lambda x: -(-x // 8) * 8
    pad128 = lambda x: -(-x // 128) * 128
    blk = lambda r, c: pad8(r) * pad128(c) * 4
    fixed = 2 * (blk(k, 1) + blk(k, d) + blk(d, k))        # codebook blocks, double-buffered
    io = 2 * (2 * blk(d, t) + 2 * blk(1, t))               # zt in + zq/idx/sse out, 2 buffers
    live = 4 * blk(k, t)                                    # score, iota, mask, one-hot
    est = fixed + io + live
    return int(min(48 * 1024 * 1024, max(32 * 1024 * 1024, 2 * est)))


# ----------------------------------------------------------------------------
# Wrapper: free reshapes only (no NCHW transposes) + scalar loss epilogue
# ----------------------------------------------------------------------------
def vector_quantizer(z, codebook, beta=0.25):
    """z: (N, D, H, W) NCHW float; codebook: (K, D). Returns (z_q NCHW, vq_loss, indices)."""
    n, d, h, w = z.shape
    k, d2 = codebook.shape
    assert d == d2
    hw = h * w

    e = codebook.astype(jnp.float32)
    et = e.T
    e2_half = 0.5 * jnp.sum(e * e, axis=1, keepdims=True)        # (K, 1), computed once

    t_hw, hw_pad = _choose_hw_tile(hw, k, n)
    num_hw_tiles = hw_pad // t_hw

    z3 = z.astype(jnp.float32).reshape(n, d, hw)                 # free contiguous reshape
    if hw_pad != hw:
        z3 = jnp.pad(z3, ((0, 0), (0, 0), (0, hw_pad - hw)))

    zq3, idx3, sse3 = pl.pallas_call(
        _vq_kernel,
        out_shape=(
            jax.ShapeDtypeStruct((n, d, hw_pad), jnp.float32),
            jax.ShapeDtypeStruct((n, 1, hw_pad), jnp.int32),
            jax.ShapeDtypeStruct((n, 1, hw_pad), jnp.float32),
        ),
        grid=(n, num_hw_tiles),
        in_specs=[
            pl.BlockSpec((k, 1), lambda b, j: (0, 0)),           # 0.5*||e||^2
            pl.BlockSpec((k, d), lambda b, j: (0, 0)),           # codebook
            pl.BlockSpec((d, k), lambda b, j: (0, 0)),           # codebook^T
            pl.BlockSpec((None, d, t_hw), lambda b, j: (b, 0, j)),  # z tile (batch squeezed)
        ],
        out_specs=(
            pl.BlockSpec((None, d, t_hw), lambda b, j: (b, 0, j)),
            pl.BlockSpec((None, 1, t_hw), lambda b, j: (b, 0, j)),
            pl.BlockSpec((None, 1, t_hw), lambda b, j: (b, 0, j)),
        ),
        compiler_params=pltpu.CompilerParams(
            dimension_semantics=("parallel", "parallel"),
            vmem_limit_bytes=_vmem_limit_bytes(k, d, t_hw),
        ),
    )(e2_half, e, et, z3)

    if hw_pad != hw:
        zq3 = zq3[:, :, :hw]
        idx3 = idx3[:, :, :hw]
        sse3 = sse3[:, :, :hw]

    # Losses (forward values): both terms are mean((z - z_q)^2)
    mse = jnp.sum(sse3) / (n * hw * d)
    vq_loss = (1.0 + beta) * mse

    z_q = zq3.reshape(n, d, h, w)                                # free reshape, already NCHW
    encoding_indices = idx3.reshape(n * hw)                      # torch (n, h, w) flatten order
    return z_q, vq_loss, encoding_indices


# ----------------------------------------------------------------------------
# Demo / self-check
# ----------------------------------------------------------------------------
if __name__ == "__main__":
    num_embeddings, embedding_dim, beta = 128, 4, 0.25

    key = jax.random.PRNGKey(0)
    k_emb, k_z = jax.random.split(key)
    codebook = jax.random.uniform(
        k_emb, (num_embeddings, embedding_dim), jnp.float32,
        minval=-1.0 / num_embeddings, maxval=1.0 / num_embeddings)
    z = jax.random.normal(k_z, (2, embedding_dim, 16, 16), jnp.float32)   # NCHW

    fwd = jax.jit(functools.partial(vector_quantizer, beta=beta))
    z_q, vq_loss, idx = fwd(z, codebook)
    jax.block_until_ready((z_q, vq_loss, idx))

    N, D, H, W = z.shape
    M = N * H * W
    assert z_q.shape == z.shape and z_q.dtype == jnp.float32
    assert idx.shape == (M,) and idx.dtype == jnp.int32
    assert vq_loss.shape == ()
    assert bool(jnp.all((idx >= 0) & (idx < num_embeddings)))
    assert bool(jnp.all(jnp.isfinite(z_q))) and bool(jnp.isfinite(vq_loss))

    # Consistency with the module's semantics, using the kernel's selected codes.
    z_flat = jnp.transpose(z, (0, 2, 3, 1)).reshape(M, D)
    gathered = codebook[idx]                                            # (M, D)
    ref_zq = (z_flat + (gathered - z_flat)).reshape(N, H, W, D).transpose(0, 3, 1, 2)
    assert bool(jnp.allclose(z_q, ref_zq, atol=1e-6))

    ref_mse = jnp.mean((z_flat - gathered) ** 2)
    assert bool(jnp.allclose(vq_loss, (1.0 + beta) * ref_mse, rtol=1e-5, atol=1e-7))

    # Nearest-neighbour optimality of the selected codes (tolerance covers fp rounding / ties).
    dist = jnp.sum((z_flat[:, None, :] - codebook[None, :, :]) ** 2, axis=-1)   # (M, K)
    chosen = jnp.take_along_axis(dist, idx[:, None], axis=1)[:, 0]
    assert bool(jnp.all(chosen <= dist.min(axis=1) + 1e-4))

    print("KERNEL_OK")
</pallas_src>

<mosaic_0001>
module attributes {stable_mosaic.version = 11 : i64} {
  func.func @_vq_kernel(%arg0: i32, %arg1: i32, %arg2: memref<128x1xf32, #tpu.memory_space<vmem>>, %arg3: memref<128x4xf32, #tpu.memory_space<vmem>>, %arg4: memref<4x128xf32, #tpu.memory_space<vmem>>, %arg5: memref<1x4x256xf32, #tpu.memory_space<vmem>>, %arg6: memref<1x4x256xf32, #tpu.memory_space<vmem>>, %arg7: memref<1x1x256xi32, #tpu.memory_space<vmem>>, %arg8: memref<1x1x256xf32, #tpu.memory_space<vmem>>) attributes {dimension_semantics = [#tpu.dimension_semantics<parallel>, #tpu.dimension_semantics<parallel>], iteration_bounds = array<i64: 2, 1>, scalar_prefetch = 0 : i64, scratch_operands = 0 : i64, tpu.core_type = #tpu.core_type<tc>, window_params = [{pipeline_mode = #tpu.pipeline_mode<synchronous>, transform_indices = @transform_0, window_bounds = array<i64: 128, 1>}, {pipeline_mode = #tpu.pipeline_mode<synchronous>, transform_indices = @transform_1, window_bounds = array<i64: 128, 4>}, {pipeline_mode = #tpu.pipeline_mode<synchronous>, transform_indices = @transform_2, window_bounds = array<i64: 4, 128>}, {transform_indices = @transform_3, window_bounds = array<i64: 1, 4, 256>}, {transform_indices = @transform_4, window_bounds = array<i64: 1, 4, 256>}, {transform_indices = @transform_5, window_bounds = array<i64: 1, 1, 256>}, {transform_indices = @transform_6, window_bounds = array<i64: 1, 1, 256>}]} {
    %c0 = arith.constant 0 : index
    %c0_0 = arith.constant 0 : index
    %0 = vector.load %arg2[%c0, %c0_0] : memref<128x1xf32, #tpu.memory_space<vmem>>, vector<128x1xf32>
    %c0_1 = arith.constant 0 : index
    %c0_2 = arith.constant 0 : index
    %1 = vector.load %arg3[%c0_1, %c0_2] : memref<128x4xf32, #tpu.memory_space<vmem>>, vector<128x4xf32>
    %c0_3 = arith.constant 0 : index
    %c0_4 = arith.constant 0 : index
    %2 = vector.load %arg4[%c0_3, %c0_4] : memref<4x128xf32, #tpu.memory_space<vmem>>, vector<4x128xf32>
    %c0_5 = arith.constant 0 : index
    %c0_6 = arith.constant 0 : index
    %c0_7 = arith.constant 0 : index
    %3 = vector.load %arg5[%c0_5, %c0_6, %c0_7] : memref<1x4x256xf32, #tpu.memory_space<vmem>>, vector<1x4x256xf32>
    %4 = vector.shape_cast %3 : vector<1x4x256xf32> to vector<4x256xf32>
    %cst = arith.constant dense<0.000000e+00> : vector<128x256xf32>
    %5 = tpu.matmul %1, %4, %cst {dimension_numbers = #tpu.dot_dimension_numbers<[1], [0], [0], [1], [0, 0, 1, 1], [], []>, precision = #tpu.contract_precision<fp32>} : vector<128x4xf32>, vector<4x256xf32>, vector<128x256xf32> -> vector<128x256xf32>
    %6 = vector.broadcast %0 : vector<128x1xf32> to vector<128x256xf32>
    %7 = arith.subf %6, %5 : vector<128x256xf32>
    %cst_8 = arith.constant dense<0x7F800000> : vector<256xf32>
    %8 = vector.multi_reduction <minimumf>, %7, %cst_8 [0] : vector<128x256xf32> to vector<256xf32>
    %9 = vector.shape_cast %8 : vector<256xf32> to vector<1x256xf32>
    %10 = tpu.iota {dimensions = array<i32: 0>} : vector<128x256xi32>
    %11 = vector.broadcast %9 : vector<1x256xf32> to vector<128x256xf32>
    %12 = arith.cmpf ole, %7, %11 : vector<128x256xf32>
    %c128_i32 = arith.constant 128 : i32
    %13 = vector.broadcast %c128_i32 : i32 to vector<128x256xi32>
    %14 = arith.select %12, %10, %13 : vector<128x256xi1>, vector<128x256xi32>
    %cst_9 = arith.constant dense<2147483647> : vector<256xi32>
    %15 = vector.multi_reduction <minsi>, %14, %cst_9 [0] : vector<128x256xi32> to vector<256xi32>
    %16 = vector.shape_cast %15 : vector<256xi32> to vector<1x256xi32>
    %17 = vector.broadcast %16 : vector<1x256xi32> to vector<128x256xi32>
    %18 = arith.cmpi eq, %10, %17 : vector<128x256xi32>
    %19 = arith.extui %18 : vector<128x256xi1> to vector<128x256xi32>
    %20 = arith.sitofp %19 : vector<128x256xi32> to vector<128x256xf32>
    %cst_10 = arith.constant dense<0.000000e+00> : vector<4x256xf32>
    %21 = tpu.matmul %2, %20, %cst_10 {dimension_numbers = #tpu.dot_dimension_numbers<[1], [0], [0], [1], [0, 0, 1, 1], [], []>, precision = #tpu.contract_precision<fp32>} : vector<4x128xf32>, vector<128x256xf32>, vector<4x256xf32> -> vector<4x256xf32>
    %22 = arith.subf %21, %4 : vector<4x256xf32>
    %23 = arith.addf %4, %22 : vector<4x256xf32>
    %c0_11 = arith.constant 0 : index
    %c0_12 = arith.constant 0 : index
    %c0_13 = arith.constant 0 : index
    %24 = vector.load %arg6[%c0_11, %c0_12, %c0_13] : memref<1x4x256xf32, #tpu.memory_space<vmem>>, vector<1x4x256xf32>
    %25 = vector.shape_cast %24 : vector<1x4x256xf32> to vector<4x256xf32>
    %26 = vector.shape_cast %23 : vector<4x256xf32> to vector<1x4x256xf32>
    tpu.vector_store %arg6[%c0_11, %c0_12, %c0_13], %26 {strides = array<i32>} : memref<1x4x256xf32, #tpu.memory_space<vmem>>, vector<1x4x256xf32>,
    %c0_14 = arith.constant 0 : index
    %c0_15 = arith.constant 0 : index
    %c0_16 = arith.constant 0 : index
    %27 = vector.load %arg7[%c0_14, %c0_15, %c0_16] : memref<1x1x256xi32, #tpu.memory_space<vmem>>, vector<1x1x256xi32>
    %28 = vector.shape_cast %27 : vector<1x1x256xi32> to vector<1x256xi32>
    %29 = vector.shape_cast %16 : vector<1x256xi32> to vector<1x1x256xi32>
    tpu.vector_store %arg7[%c0_14, %c0_15, %c0_16], %29 {strides = array<i32>} : memref<1x1x256xi32, #tpu.memory_space<vmem>>, vector<1x1x256xi32>,
    %30 = arith.mulf %22, %22 : vector<4x256xf32>
    %cst_17 = arith.constant dense<0.000000e+00> : vector<256xf32>
    %31 = vector.multi_reduction <add>, %30, %cst_17 [0] : vector<4x256xf32> to vector<256xf32>
    %32 = vector.shape_cast %31 : vector<256xf32> to vector<1x256xf32>
    %c0_18 = arith.constant 0 : index
    %c0_19 = arith.constant 0 : index
    %c0_20 = arith.constant 0 : index
    %33 = vector.load %arg8[%c0_18, %c0_19, %c0_20] : memref<1x1x256xf32, #tpu.memory_space<vmem>>, vector<1x1x256xf32>
    %34 = vector.shape_cast %33 : vector<1x1x256xf32> to vector<1x256xf32>
    %35 = vector.shape_cast %32 : vector<1x256xf32> to vector<1x1x256xf32>
    tpu.vector_store %arg8[%c0_18, %c0_19, %c0_20], %35 {strides = array<i32>} : memref<1x1x256xf32, #tpu.memory_space<vmem>>, vector<1x1x256xf32>,
    return
  }
  func.func @transform_0(%arg0: i32, %arg1: i32) -> (i32, i32) {
    %c0_i32 = arith.constant 0 : i32
    %c0_i32_0 = arith.constant 0 : i32
    %c0_i32_1 = arith.constant 0 : i32
    return %c0_i32, %c0_i32_0 : i32, i32
  }
  func.func @transform_1(%arg0: i32, %arg1: i32) -> (i32, i32) {
    %c0_i32 = arith.constant 0 : i32
    %c0_i32_0 = arith.constant 0 : i32
    %c0_i32_1 = arith.constant 0 : i32
    return %c0_i32, %c0_i32_0 : i32, i32
  }
  func.func @transform_2(%arg0: i32, %arg1: i32) -> (i32, i32) {
    %c0_i32 = arith.constant 0 : i32
    %c0_i32_0 = arith.constant 0 : i32
    %c0_i32_1 = arith.constant 0 : i32
    return %c0_i32, %c0_i32_0 : i32, i32
  }
  func.func @transform_3(%arg0: i32, %arg1: i32) -> (i32, i32, i32) {
    %c0_i32 = arith.constant 0 : i32
    %c0_i32_0 = arith.constant 0 : i32
    return %arg0, %c0_i32, %arg1 : i32, i32, i32
  }
  func.func @transform_4(%arg0: i32, %arg1: i32) -> (i32, i32, i32) {
    %c0_i32 = arith.constant 0 : i32
    %c0_i32_0 = arith.constant 0 : i32
    return %arg0, %c0_i32, %arg1 : i32, i32, i32
  }
  func.func @transform_5(%arg0: i32, %arg1: i32) -> (i32, i32, i32) {
    %c0_i32 = arith.constant 0 : i32
    %c0_i32_0 = arith.constant 0 : i32
    return %arg0, %c0_i32, %arg1 : i32, i32, i32
  }
  func.func @transform_6(%arg0: i32, %arg1: i32) -> (i32, i32, i32) {
    %c0_i32 = arith.constant 0 : i32
    %c0_i32_0 = arith.constant 0 : i32
    return %arg0, %c0_i32, %arg1 : i32, i32, i32
  }
}

</mosaic_0001>

<bundles_post_ra>
// kernel: vector_quantizer.1
= control target key start
LH: loop header
LB: loop body
LE: loop exit
PB: predicated region body
PF: predicated region fallthrough
CT: control target
= control target key end

     0   :  { %s5326_s0 = inlined_call_operand.vmem [shape: f32[128,1], index: 0, kind: input, shape index: {}]   ;;  %s5327_s1 = inlined_call_operand.vmem [shape: f32[128,4], index: 1, kind: input, shape index: {}]   ;;  %s5328_s2 = inlined_call_operand.vmem [shape: f32[4,128], index: 2, kind: input, shape index: {}]   ;;  %s5329_s3 = inlined_call_operand.vmem [shape: f32[2,4,256], index: 3, kind: input, shape index: {}]   ;;  %s5330_s4 = inlined_call_operand.vmem [shape: f32[2,4,256], index: 4, kind: output, shape index: {0}]   ;;  %s5331_s5 = inlined_call_operand.hbm [shape: s32[2,1,256], index: 5, kind: output, shape index: {1}]   ;;  %s5332_s6 = inlined_call_operand.vmem [shape: f32[2,1,256], index: 6, kind: output, shape index: {2}]  }
   0x1   :  { %5386 = sst [smem:[#allocation29_spill]] %s5326_s0 }
   0x2   :  { %12 = vsyncpa [#allocation3], 0 }
   0x3   :  { %14 = vsyncpa [#allocation3 + $0x1], 0  ;;  %s3286_s21 = smov 0   ;;  %s3288_s22 = smov 0  }
   0x4   :  { %s3290_s23 = smov 0   ;;  %s3292_s24 = smov 0  }
   0x5   :  { %s3294_s25 = smov 0   ;;  %s3296_s26 = smov 0  }
   0x6 LB: > { %s2962_s27 = sadd.s32 4294967295, %s3246_s26   ;;  %s2963_s28 = sadd.s32 4294967294, %s3246_s26   ;;  %s3246_s26 = sphi %s3296_s26, %s20_s26   ;;  %s3242_s25 = sphi %s3294_s25, %s5499_s25   ;;  %s3238_s24 = sphi %s3292_s24, %s5498_s24   ;;  %s3234_s23 = sphi %s3290_s23, %s5497_s23   ;;  %s3230_s22 = sphi %s3288_s22, %s5496_s22   ;;  %s3226_s21 = sphi %s3286_s21, %s5495_s21  }
   0x7   : > { %s32_s29 = sadd.s32 1, %s3242_s25  ;;  %s160_s30 = sadd.s32 1, %s3234_s23 }
   0x8   : > { %p34_p0 = scmp.ge.s32.totalorder %s32_s29, 2  ;;  %p170_p1 = scmp.ne.s32.totalorder %s3234_s23, %s3230_s22 }
   0x9   : > { %p171_p2 = scmp.eq.s32.totalorder %s2962_s27, 1  ;;  %p176_p3 = scmp.ne.s32.totalorder %s3230_s22, %s3226_s21 }
   0xa   : > { %s5501_s29 = smov (%p34_p0, %s32_s29), 0  ;;  %p177_p5 = scmp.eq.s32.totalorder %s2963_s28, 1 }
   0xb   : > { %p3326_p4 = por %p171_p2, %p170_p1  ;;  %s155_s8 = ssub.s32 %s3242_s25, %s5501_s29 }
   0xc   : > { %p2966_p6 = scmp.ge.s32.totalorder %s3246_s26, 1  ;;  %p158_p7 = scmp.eq.s32.totalorder %s155_s8, 0 }
   0xd   : > { %p3333_p8 = por %p177_p5, %p176_p3  ;;  %p245_p9 = scmp.lt.s32.totalorder %s3246_s26, 3 }
   0xe   : > { %s3339_s10 = scalar_select %p158_p7, %s3234_s23, %s160_s30  }
   0xf   : > { %p246_p10 = pnand %p2966_p6, %p245_p9 }
  0x11   : > { %249 = sbr.rel (%p246_p10) target bundleno = 837 (0x345), region = 36 }
  0x16   : > { %p297_p11 = scmp.lt.s32.totalorder %s3238_s24, 1  ;;  %v342_v0 = vld [vmem:[%s5327_s1] sm:$0xff]  ;;  %vm364_vm0 = vcmask 31744   ;;  %v343_v2 = vld [vmem:[%s5327_s1 + $0x8] sm:$0xff]  ;;  %v344_v9 = vld [vmem:[%s5327_s1 + $0x10] sm:$0xff]  ;;  %vm5353_vm1 = vcmask 1043456  }
  0x17   : > { %v366_v1 = vsel %vm364_vm0, %v342_v0, 0  ;;  %v369_v5 = vsel %vm364_vm0, %v343_v2, 0  ;;  %v372_v10 = vsel %vm364_vm0, %v344_v9, 0  ;;  %v345_v22 = vld [vmem:[%s5327_s1 + $0x18] sm:$0xff]  ;;  %v346_v37 = vld [vmem:[%s5327_s1 + $0x20] sm:$0xff]  ;;  %v347_v44 = vld [vmem:[%s5327_s1 + $0x28] sm:$0xff] }
  0x18   : > { %s3350_s15 = scalar_select %p297_p11, %s3238_s24, 1  ;;  %v3352_v3 = vand.u32 4294901760, %v366_v1  ;;  %v3370_v8 = vand.u32 4294901760, %v369_v5  ;;  %v3381_v13 = vand.u32 4294901760, %v372_v10  ;;  %v375_v28 = vsel %vm364_vm0, %v345_v22, 0  ;;  %v348_v51 = vld [vmem:[%s5327_s1 + $0x30] sm:$0xff] }
  0x19   : > { %v3408_v34 = vand.u32 4294901760, %v375_v28  ;;  %v378_v40 = vsel %vm364_vm0, %v346_v37, 0  ;;  %v381_v47 = vsel %vm364_vm0, %v347_v44, 0  ;;  %v384_v54 = vsel %vm364_vm0, %v348_v51, 0  ;;  %v349_v58 = vld [vmem:[%s5327_s1 + $0x38] sm:$0xff]  ;;  %s5403_s0 = sld [smem:[#allocation29_spill]] }
  0x1a   : > { %s5385_s16 = sshll.u32 %s3350_s15, 3  ;;  %v3356_v4 = vsub.f32 %v366_v1, %v3352_v3  ;;  %v3379_v12 = vsub.f32 %v369_v5, %v3370_v8  ;;  %v3399_v26 = vsub.f32 %v372_v10, %v3381_v13  ;;  %v3428_v43 = vand.u32 4294901760, %v378_v40  ;;  %v350_v1 = vld [vmem:[%s5327_s1 + $0x40] sm:$0xff]  ;;  %s283_s28 = sand.u32 1, %s3230_s22  }
  0x1b   : > { %s304_s19 = scalar_lea.vmem %s5329_s3, %s5385_s16  ;;  %v3418_v39 = vsub.f32 %v375_v28, %v3408_v34  ;;  %v3448_v50 = vand.u32 4294901760, %v381_v47  ;;  %v3468_v57 = vand.u32 4294901760, %v384_v54  ;;  %v387_v61 = vsel %vm364_vm0, %v349_v58, 0  ;;  %s5054_s30 = sshll.u32 %s283_s28, 1 }
  0x1c   : > { %v3364_v6 = vld [vmem:[%s304_s19] sm:$0xff]  ;;  %v3368_v7 = vand.u32 4294901760, %v3356_v4  ;;  %v3387_v18 = vand.u32 4294901760, %v3379_v12  ;;  %v3406_v33 = vand.u32 4294901760, %v3399_v26  ;;  %v3438_v46 = vsub.f32 %v378_v40, %v3428_v43  ;;  %s285_s8 = scalar_lea.vmem [#allocation2], %s5054_s30  ;;  %s3102_s11 = sshll.u32 %s3238_s24, 1 }
  0x1d   : > { %5389 = vst [vmem:[#allocation5_spill] sm:$0xff] %v3364_v6  ;;  %v3426_v42 = vand.u32 4294901760, %v3418_v39  ;;  %v3458_v53 = vsub.f32 %v381_v47, %v3448_v50  ;;  %v3478_v60 = vsub.f32 %v384_v54, %v3468_v57  ;;  %v3488_v0 = vand.u32 4294901760, %v387_v61  ;;  %v354_v47 = vld [vmem:[%s5327_s1 + $0x60] sm:$0xff]  ;;  %s2809_s14 = scalar_lea.hbm %s5331_s5, %s3102_s11  ;;  %s2811_s17 = sshll.u32 %s285_s8, 4  ;;  %s2812_s17 = int_to_ptr.vmem [resolvable:$true] %s2811_s17 }
  0x1e   : > { %361 = vst [vmem:[#allocation1] ss:$2 sm:$0xff] %v3364_v6  ;;  %v438_v11 = vsub.f32 %v3356_v4, %v3368_v7  ;;  %v446_v25 = vsub.f32 %v3379_v12, %v3387_v18  ;;  %v454_v38 = vsub.f32 %v3399_v26, %v3406_v33  ;;  %v3446_v49 = vand.u32 4294901760, %v3438_v46  ;;  %s2813_s18 = sshll.u32 %s2809_s14, 4  ;;  %s2785_s19 = scalar_lea.sflag [#allocation3], %s283_s28  ;;  %s2814_s18 = int_to_ptr.hbm [resolvable:$true] %s2813_s18 }
  0x1f   : > { %v462_v45 = vsub.f32 %v3418_v39, %v3426_v42  ;;  %v3466_v56 = vand.u32 4294901760, %v3458_v53  ;;  %v3486_v63 = vand.u32 4294901760, %v3478_v60  ;;  %v3498_v5 = vsub.f32 %v387_v61, %v3488_v0  ;;  %s3182_s20 = sshra.s32 %s2814_s18, 4  ;;  %s3183_s20 = int_to_ptr.hbm [resolvable:$true] %s3182_s20 }
  0x20   : > { %v3384_v17 = vand.u32 4294901760, %v438_v11  ;;  %v3403_v32 = vand.u32 4294901760, %v446_v25  ;;  %v3423_v41 = vand.u32 4294901760, %v454_v38  ;;  %v470_v52 = vsub.f32 %v3438_v46, %v3446_v49  ;;  %s3184_s27 = scalar_lea.hbm %s3183_s20, 2  ;;  %p3189_p1 = scmp.lt.s32.totalorder %s3183_s20, %s5331_s5 }
  0x21   : > { %v3443_v48 = vand.u32 4294901760, %v462_v45  ;;  %v478_v59 = vsub.f32 %v3458_v53, %v3466_v56  ;;  %v486_v2 = vsub.f32 %v3478_v60, %v3486_v63  ;;  %v390_v9 = vsel %vm364_vm0, %v350_v1, 0  ;;  %v355_v1 = vld [vmem:[%s5327_s1 + $0x68] sm:$0xff]  ;;  %p3185_p12 = scmp.ne.s32.totalorder %s3183_s20, %s3184_s27 }
  0x22   : > { %v3463_v55 = vand.u32 4294901760, %v470_v52  ;;  %v3506_v11 = vand.u32 4294901760, %v3498_v5  ;;  %v402_v54 = vsel %vm364_vm0, %v354_v47, 0 }
  0x23   : > { %v3483_v62 = vand.u32 4294901760, %v478_v59  ;;  %v3503_v10 = vand.u32 4294901760, %v486_v2  ;;  %v3588_v61 = vand.u32 4294901760, %v402_v54  ;;  %p3186_p13 = pnand %p3185_p12, %p3326_p4 }
  0x25   : > { %v362_v14 = vld.sshfl [vmem:[#allocation1] sm:$0xff pattern:$0x75316420]  ;;  %v363_v15 = vld.sshfl [vmem:[#allocation1 + $0x8] sm:$0xff pattern:$0x75316420]  ;;  %p3187_p0 = pneg %p3186_p13 }
  0x26   : > { %v414_v16 = vsel %vm5353_vm1, %v362_v14, 0  ;;  %v416_v19 = vsel %vm5353_vm1, %v363_v15, 0  ;;  %2731 = vst [vmem:[#allocation1] ss:$2 sm:$0xff] %v3364_v6  ;;  %v3508_v14 = vand.u32 4294901760, %v390_v9  ;;  %v351_v15 = vld [vmem:[%s5327_s1 + $0x48] sm:$0xff] }
  0x27   : > { %v433_v20 = vand.u32 4294901760, %v414_v16  ;;  %v1044_v21 = vand.u32 4294901760, %v416_v19 }
  0x29   : > { %434 = vmatpush.msra.mxu0 %v433_v20  ;;  %v580_v23 = vsub.f32 %v414_v16, %v433_v20  ;;  %765 = vmatpush.msra.mxu3 %v433_v20  ;;  %v1191_v24 = vsub.f32 %v416_v19, %v1044_v21  ;;  %v494_v16 = vsub.f32 %v3498_v5, %v3506_v11 }
  0x2a   : > { %440 = vmatmul.f32.vlgmr.msra.gmra.mxu0 %v3384_v17  ;;  %769 = vmatmul.f32.vlgmr.msra.gmra.mxu3 %v3368_v7  ;;  %v3518_v19 = vsub.f32 %v390_v9, %v3508_v14  ;;  %v3598_v9 = vsub.f32 %v402_v54, %v3588_v61  ;;  %v357_v54 = vld [vmem:[%s5327_s1 + $0x78] sm:$0xff] }
  0x2b   : > { %667 = vmatpush.msra.mxu2 %v580_v23  ;;  %v581_v27 = vand.u32 4294901760, %v580_v23  ;;  %v1192_v29 = vand.u32 4294901760, %v1191_v24 }
  0x2c   : > { %670 = vmatmul.f32.vlgmr.msra.gmra.mxu2 %v3356_v4  ;;  %v3526_v22 = vand.u32 4294901760, %v3518_v19  ;;  %5395 = vst [vmem:[#allocation11_spill] sm:$0xff] %v3598_v9 }
  0x2d   : > { %v582_v30 = vsub.f32 %v580_v23, %v581_v27  ;;  %1045 = vmatpush.msrb.mxu2 %v1044_v21  ;;  %881 = vmatpush.msrb.mxu0 %v581_v27  ;;  %v1193_v31 = vsub.f32 %v1191_v24, %v1192_v29 }
  0x2e   : > { %v502_v25 = vsub.f32 %v3518_v19, %v3526_v22 }
  0x2f   : > { %1492 = vmatpush.msra.mxu2 %v1192_v29  ;;  %1278 = vmatpush.msra.mxu0 %v1191_v24  ;;  %v583_v35 = vand.u32 4294901760, %v582_v30  ;;  %v1194_v36 = vand.u32 4294901760, %v1193_v31  ;;  %v352_v24 = vld [vmem:[%s5327_s1 + $0x50] sm:$0xff] }
  0x30   : > { %v396_v28 = vsel %vm364_vm0, %v352_v24, 0  ;;  %v3543_v29 = vand.u32 4294901760, %v502_v25  ;;  %v356_v25 = vld [vmem:[%s5327_s1 + $0x70] sm:$0xff] }
  0x31   : > { %584 = vmatpush.msra.mxu1 %v583_v35  ;;  %1195 = vmatpush.msrb.mxu3 %v1194_v36  ;;  %v3548_v31 = vand.u32 4294901760, %v396_v28  ;;  %v353_v35 = vld [vmem:[%s5327_s1 + $0x58] sm:$0xff] }
  0x32   : > { %448 = vmatmul.f32.gmra.mxu0 %v3403_v32  ;;  %586 = vmatmul.f32.vlgmr.msra.gmra.mxu1 %v3352_v3  ;;  %v399_v38 = vsel %vm364_vm0, %v353_v35, 0 }
  0x33   : > { %775 = vmatmul.f32.gmra.mxu3 %v3387_v18  ;;  %963 = vmatpush.msrb.mxu1 %v433_v20  ;;  %v393_v20 = vsel %vm364_vm0, %v351_v15, 0  ;;  %v3558_v37 = vsub.f32 %v396_v28, %v3548_v31  ;;  %v3568_v45 = vand.u32 4294901760, %v399_v38  ;;  %v405_v15 = vsel %vm364_vm0, %v355_v1, 0 }
  0x34   : > { %675 = vmatmul.f32.gmra.mxu2 %v3379_v12  ;;  %1574 = vmatpush.msra.mxu3 %v1044_v21  ;;  %v3528_v23 = vand.u32 4294901760, %v393_v20  ;;  %v3608_v24 = vand.u32 4294901760, %v405_v15 }
  0x35   : > { %1376 = vmatpush.msra.mxu1 %v1044_v21  ;;  %v3523_v21 = vand.u32 4294901760, %v494_v16  ;;  %5391 = vst [vmem:[#allocation7_spill] sm:$0xff] %v3558_v37  ;;  %v3566_v44 = vand.u32 4294901760, %v3558_v37  ;;  %v3578_v52 = vsub.f32 %v399_v38, %v3568_v45 }
  0x36   : > { %v3538_v27 = vsub.f32 %v393_v20, %v3528_v23  ;;  %v3606_v20 = vand.u32 4294901760, %v3598_v9  ;;  %v3618_v35 = vsub.f32 %v405_v15, %v3608_v24  ;;  %v411_v15 = vsel %vm364_vm0, %v357_v54, 0 }
  0x37   : > { %5392 = vst [vmem:[#allocation8_spill] sm:$0xff] %v3566_v44  ;;  %v518_v51 = vsub.f32 %v3558_v37, %v3566_v44  ;;  %v3586_v59 = vand.u32 4294901760, %v3578_v52  ;;  %v3648_v6 = vand.u32 4294901760, %v411_v15 }
  0x38   : > { %v3546_v30 = vand.u32 4294901760, %v3538_v27  ;;  %5393 = vst [vmem:[#allocation9_spill] sm:$0xff] %v3578_v52  ;;  %v534_v28 = vsub.f32 %v3598_v9, %v3606_v20  ;;  %v3626_v47 = vand.u32 4294901760, %v3618_v35 }
  0x39   : > { %v3583_v58 = vand.u32 4294901760, %v518_v51  ;;  %5394 = vst [vmem:[#allocation10_spill] sm:$0xff] %v3586_v59  ;;  %v526_v2 = vsub.f32 %v3578_v52, %v3586_v59 }
  0x3a   : > { %456 = vmatmul.f32.gmra.mxu0 %v3423_v41  ;;  %590 = vmatmul.f32.gmra.mxu1 %v3370_v8  ;;  %5390 = vst [vmem:[#allocation6_spill] sm:$0xff] %v3546_v30  ;;  %v510_v36 = vsub.f32 %v3538_v27, %v3546_v30  ;;  %v3623_v38 = vand.u32 4294901760, %v534_v28  ;;  %v542_v1 = vsub.f32 %v3618_v35, %v3626_v47 }
  0x3b   : > { %781 = vmatmul.f32.gmra.mxu3 %v3406_v33  ;;  %v3603_v16 = vand.u32 4294901760, %v526_v2  ;;  %5396 = vst [vmem:[#allocation12_spill] sm:$0xff] %v3606_v20 }
  0x3c   : > { %680 = vmatmul.f32.gmra.mxu2 %v3399_v26  ;;  %v3563_v40 = vand.u32 4294901760, %v510_v36  ;;  %5397 = vst [vmem:[#allocation13_spill] sm:$0xff] %v3618_v35  ;;  %v408_v36 = vsel %vm364_vm0, %v356_v25, 0  ;;  %v3643_v25 = vand.u32 4294901760, %v542_v1 }
  0x3d   : > { %5398 = vst [vmem:[#allocation14_spill] sm:$0xff] %v3626_v47  ;;  %v3628_v51 = vand.u32 4294901760, %v408_v36 }
  0x3f   : > { %v3638_v2 = vsub.f32 %v408_v36, %v3628_v51 }
  0x41   : > { %5399 = vst [vmem:[#allocation15_spill] sm:$0xff] %v3638_v2  ;;  %v3646_v28 = vand.u32 4294901760, %v3638_v2 }
  0x42   : > { %464 = vmatmul.f32.gmra.mxu0 %v3443_v48  ;;  %594 = vmatmul.f32.gmra.mxu1 %v3381_v13 }
  0x43   : > { %787 = vmatmul.f32.gmra.mxu3 %v3426_v42  ;;  %5400 = vst [vmem:[#allocation16_spill] sm:$0xff] %v3646_v28  ;;  %v550_v36 = vsub.f32 %v3638_v2, %v3646_v28 }
  0x44   : > { %685 = vmatmul.f32.gmra.mxu2 %v3418_v39 }
  0x45   : > { %v3659_v54 = vand.u32 4294901760, %v550_v36  ;;  %v3248_v36 = vmov 0  }
  0x46   : > { %3165 = vset.pattern.permute.xlu0 %v3248_v36  ;;  %3166 = vset.pattern.permute.xlu1 %v3248_v36 }
  0x47   : > { %3167 = vset.pattern.permute.xlu2 %v3248_v36 }
  0x4a   : > { %472 = vmatmul.f32.gmra.mxu0 %v3463_v55  ;;  %598 = vmatmul.f32.gmra.mxu1 %v3408_v34 }
  0x4b   : > { %793 = vmatmul.f32.gmra.mxu3 %v3446_v49 }
  0x4c   : > { %690 = vmatmul.f32.gmra.mxu2 %v3438_v46 }
  0x52   : > { %480 = vmatmul.f32.gmra.mxu0 %v3483_v62  ;;  %602 = vmatmul.f32.gmra.mxu1 %v3428_v43 }
  0x53   : > { %799 = vmatmul.f32.gmra.mxu3 %v3466_v56 }
  0x54   : > { %695 = vmatmul.f32.gmra.mxu2 %v3458_v53 }
  0x5a   : > { %488 = vmatmul.f32.gmra.mxu0 %v3503_v10  ;;  %606 = vmatmul.f32.gmra.mxu1 %v3448_v50 }
  0x5b   : > { %805 = vmatmul.f32.gmra.mxu3 %v3486_v63 }
  0x5c   : > { %700 = vmatmul.f32.gmra.mxu2 %v3478_v60 }
  0x62   : > { %496 = vmatmul.f32.gmra.mxu0 %v3523_v21  ;;  %610 = vmatmul.f32.gmra.mxu1 %v3468_v57 }
  0x63   : > { %811 = vmatmul.f32.gmra.mxu3 %v3506_v11 }
  0x64   : > { %705 = vmatmul.f32.gmra.mxu2 %v3498_v5 }
  0x6a   : > { %504 = vmatmul.f32.gmra.mxu0 %v3543_v29  ;;  %614 = vmatmul.f32.gmra.mxu1 %v3488_v0 }
  0x6b   : > { %817 = vmatmul.f32.gmra.mxu3 %v3526_v22 }
  0x6c   : > { %710 = vmatmul.f32.gmra.mxu2 %v3518_v19 }
  0x72   : > { %512 = vmatmul.f32.gmra.mxu0 %v3563_v40  ;;  %618 = vmatmul.f32.gmra.mxu1 %v3508_v14 }
  0x73   : > { %823 = vmatmul.f32.gmra.mxu3 %v3546_v30 }
  0x74   : > { %715 = vmatmul.f32.gmra.mxu2 %v3538_v27 }
  0x7a   : > { %520 = vmatmul.f32.gmra.mxu0 %v3583_v58  ;;  %622 = vmatmul.f32.gmra.mxu1 %v3528_v23 }
  0x7b   : > { %829 = vmatmul.f32.gmra.mxu3 %v3566_v44 }
  0x7c   : > { %720 = vmatmul.f32.gmra.mxu2 %v3558_v37 }
  0x82   : > { %528 = vmatmul.f32.gmra.mxu0 %v3603_v16  ;;  %626 = vmatmul.f32.gmra.mxu1 %v3548_v31 }
  0x83   : > { %835 = vmatmul.f32.gmra.mxu3 %v3586_v59 }
  0x84   : > { %725 = vmatmul.f32.gmra.mxu2 %v3578_v52 }
  0x8a   : > { %536 = vmatmul.f32.gmra.mxu0 %v3623_v38  ;;  %630 = vmatmul.f32.gmra.mxu1 %v3568_v45 }
  0x8b   : > { %841 = vmatmul.f32.gmra.mxu3 %v3606_v20  ;;  %v3655_v20 = vsub.f32 %v411_v15, %v3648_v6  ;;  %v326_v15 = vld [vmem:[%s5403_s0] sm:$0xff] }
  0x8c   : > { %730 = vmatmul.f32.gmra.mxu2 %v3598_v9  ;;  %1642 = vperm.xlu0 %3165, %v326_v15  }
  0x8d   : > { %5401 = vst [vmem:[#allocation17_spill] sm:$0xff] %v3655_v20  ;;  %v3662_v1 = vand.u32 4294901760, %v3655_v20 }
  0x8f   : > { %5402 = vst [vmem:[#allocation18_spill] sm:$0xff] %v3662_v1  ;;  %v558_v59 = vsub.f32 %v3655_v20, %v3662_v1 }
  0x92   : > { %544 = vmatmul.f32.gmra.mxu0 %v3643_v25  ;;  %634 = vmatmul.f32.gmra.mxu1 %v3588_v61 }
  0x93   : > { %847 = vmatmul.f32.gmra.mxu3 %v3626_v47  ;;  %v3673_v47 = vand.u32 4294901760, %v558_v59  ;;  %v328_v59 = vld [vmem:[%s5403_s0 + $0x10] sm:$0xff] }
  0x94   : > { %735 = vmatmul.f32.gmra.mxu2 %v3618_v35  ;;  %1652 = vperm.xlu1 %3166, %v328_v59  }
  0x9a   : > { %552 = vmatmul.f32.gmra.mxu0 %v3659_v54  ;;  %638 = vmatmul.f32.gmra.mxu1 %v3608_v24 }
  0x9b   : > { %853 = vmatmul.f32.gmra.mxu3 %v3646_v28  ;;  %v327_v28 = vld [vmem:[%s5403_s0 + $0x8] sm:$0xff] }
  0x9c   : > { %740 = vmatmul.f32.gmra.mxu2 %v3638_v2  ;;  %1647 = vperm.xlu0 %3165, %v327_v28  }
  0xa2   : > { %560 = vmatmul.f32.gmra.mxu0 %v3673_v47  ;;  %642 = vmatmul.f32.gmra.mxu1 %v3628_v51 }
  0xa3   : > { %859 = vmatmul.f32.gmra.mxu3 %v3662_v1 }
  0xa4   : > { %745 = vmatmul.f32.gmra.mxu2 %v3655_v20 }
  0xa7   : > { %v441_v2 = vpop.f32.mrf.mxu0 }
  0xaa   : > { %646 = vmatmul.f32.gmra.mxu1 %v3648_v6  ;;  %883 = vmatmul.f32.vlgmr.msrb.gmra.mxu0 %v3352_v3 }
  0xab   : > { %1197 = vmatmul.f32.vlgmr.msrb.gmra.mxu3 %v3352_v3 }
  0xac   : > { %1051 = vmatmul.f32.vlgmr.msrb.gmra.mxu2 %v3384_v17  ;;  %v329_v17 = vld [vmem:[%s5403_s0 + $0x18] sm:$0xff] }
  0xad   : > { %v770_v15 = vpop.f32.mrf.mxu3  ;;  %1657 = vperm.xlu1 %3166, %v329_v17  }
  0xaf   : > { %v449_v36 = vpop.f32.mrf.mxu0  ;;  %v587_v1 = vpop.f32.mrf.mxu1 }
  0xb0   : > { %v588_v20 = vadd.f32 %v587_v1, %v441_v2  ;;  %v671_v35 = vpop.f32.mrf.mxu2 }
  0xb2   : > { %v672_v28 = vadd.f32 %v671_v35, %v588_v20  ;;  %887 = vmatmul.f32.gmra.mxu0 %v3370_v8  ;;  %965 = vmatmul.f32.vlgmr.msrb.gmra.mxu1 %v3352_v3 }
  0xb3   : > { %1201 = vmatmul.f32.gmra.mxu3 %v3370_v8 }
  0xb4   : > { %v3692_v9 = vadd.f32 %v770_v15, %v672_v28  ;;  %1059 = vmatmul.f32.gmra.mxu2 %v3403_v32 }
  0xb6   : > { %v776_v59 = vpop.f32.mrf.mxu3 }
  0xb7   : > { %v457_v44 = vpop.f32.mrf.mxu0  ;;  %v591_v2 = vpop.f32.mrf.mxu1 }
  0xb8   : > { %v592_v1 = vadd.f32 %v591_v2, %v449_v36  ;;  %v676_v20 = vpop.f32.mrf.mxu2 }
  0xba   : > { %v677_v35 = vadd.f32 %v676_v20, %v592_v1  ;;  %891 = vmatmul.f32.gmra.mxu0 %v3381_v13  ;;  %969 = vmatmul.f32.gmra.mxu1 %v3370_v8 }
  0xbb   : > { %1205 = vmatmul.f32.gmra.mxu3 %v3381_v13 }
  0xbc   : > { %v3701_v15 = vadd.f32 %v776_v59, %v677_v35  ;;  %1067 = vmatmul.f32.gmra.mxu2 %v3423_v41 }
  0xbe   : > { %v782_v32 = vpop.f32.mrf.mxu3 }
  0xbf   : > { %v465_v28 = vpop.f32.mrf.mxu0  ;;  %v595_v52 = vpop.f32.mrf.mxu1 }
  0xc0   : > { %v596_v17 = vadd.f32 %v595_v52, %v457_v44  ;;  %v681_v30 = vpop.f32.mrf.mxu2 }
  0xc2   : > { %v682_v37 = vadd.f32 %v681_v30, %v596_v17  ;;  %895 = vmatmul.f32.gmra.mxu0 %v3408_v34  ;;  %973 = vmatmul.f32.gmra.mxu1 %v3381_v13 }
  0xc3   : > { %1209 = vmatmul.f32.gmra.mxu3 %v3408_v34 }
  0xc4   : > { %v3707_v36 = vadd.f32 %v782_v32, %v682_v37  ;;  %1075 = vmatmul.f32.gmra.mxu2 %v3443_v48  ;;  %v332_v48 = vld [vmem:[%s5403_s0 + $0x30] sm:$0xff] }
  0xc5   : > { %1672 = vperm.xlu0 %3165, %v332_v48  }
  0xc6   : > { %v788_v59 = vpop.f32.mrf.mxu3 }
  0xc7   : > { %v473_v2 = vpop.f32.mrf.mxu0  ;;  %v599_v1 = vpop.f32.mrf.mxu1 }
  0xc8   : > { %v600_v41 = vadd.f32 %v599_v1, %v465_v28  ;;  %v686_v20 = vpop.f32.mrf.mxu2 }
  0xca   : > { %v687_v35 = vadd.f32 %v686_v20, %v600_v41  ;;  %899 = vmatmul.f32.gmra.mxu0 %v3428_v43  ;;  %977 = vmatmul.f32.gmra.mxu1 %v3408_v34 }
  0xcb   : > { %1213 = vmatmul.f32.gmra.mxu3 %v3428_v43 }
  0xcc   : > { %v3713_v30 = vadd.f32 %v788_v59, %v687_v35  ;;  %1083 = vmatmul.f32.gmra.mxu2 %v3463_v55  ;;  %v330_v55 = vld [vmem:[%s5403_s0 + $0x20] sm:$0xff] }
  0xcd   : > { %1662 = vperm.xlu2 %3167, %v330_v55  }
  0xce   : > { %v794_v37 = vpop.f32.mrf.mxu3 }
  0xcf   : > { %v481_v44 = vpop.f32.mrf.mxu0  ;;  %v603_v52 = vpop.f32.mrf.mxu1 }
  0xd0   : > { %v604_v32 = vadd.f32 %v603_v52, %v473_v2  ;;  %v691_v28 = vpop.f32.mrf.mxu2  ;;  %v333_v2 = vld [vmem:[%s5403_s0 + $0x38] sm:$0xff] }
  0xd1   : > { %1677 = vperm.xlu1 %3166, %v333_v2  }
  0xd2   : > { %v692_v17 = vadd.f32 %v691_v28, %v604_v32  ;;  %903 = vmatmul.f32.gmra.mxu0 %v3448_v50  ;;  %981 = vmatmul.f32.gmra.mxu1 %v3428_v43 }
  0xd3   : > { %1217 = vmatmul.f32.gmra.mxu3 %v3448_v50 }
  0xd4   : > { %v3722_v59 = vadd.f32 %v794_v37, %v692_v17  ;;  %1091 = vmatmul.f32.gmra.mxu2 %v3483_v62  ;;  %v331_v37 = vld [vmem:[%s5403_s0 + $0x28] sm:$0xff] }
  0xd5   : > { %1667 = vperm.xlu2 %3167, %v331_v37  }
  0xd6   : > { %v800_v1 = vpop.f32.mrf.mxu3 }
  0xd7   : > { %v489_v41 = vpop.f32.mrf.mxu0  ;;  %v607_v20 = vpop.f32.mrf.mxu1 }
  0xd8   : > { %v608_v35 = vadd.f32 %v607_v20, %v481_v44  ;;  %v696_v48 = vpop.f32.mrf.mxu2 }
  0xda   : > { %v697_v52 = vadd.f32 %v696_v48, %v608_v35  ;;  %907 = vmatmul.f32.gmra.mxu0 %v3468_v57  ;;  %985 = vmatmul.f32.gmra.mxu1 %v3448_v50 }
  0xdb   : > { %1221 = vmatmul.f32.gmra.mxu3 %v3468_v57 }
  0xdc   : > { %v3734_v62 = vadd.f32 %v800_v1, %v697_v52  ;;  %1099 = vmatmul.f32.gmra.mxu2 %v3503_v10  ;;  %v335_v10 = vld [vmem:[%s5403_s0 + $0x48] sm:$0xff] }
  0xdd   : > { %1687 = vperm.xlu0 %3165, %v335_v10  }
  0xde   : > { %v806_v32 = vpop.f32.mrf.mxu3 }
  0xdf   : > { %v497_v28 = vpop.f32.mrf.mxu0  ;;  %v611_v44 = vpop.f32.mrf.mxu1 }
  0xe0   : > { %v612_v17 = vadd.f32 %v611_v44, %v489_v41  ;;  %v701_v55 = vpop.f32.mrf.mxu2 }
  0xe2   : > { %v702_v2 = vadd.f32 %v701_v55, %v612_v17  ;;  %911 = vmatmul.f32.gmra.mxu0 %v3488_v0  ;;  %989 = vmatmul.f32.gmra.mxu1 %v3468_v57 }
  0xe3   : > { %1225 = vmatmul.f32.gmra.mxu3 %v3488_v0 }
  0xe4   : > { %v3743_v1 = vadd.f32 %v806_v32, %v702_v2  ;;  %1107 = vmatmul.f32.gmra.mxu2 %v3523_v21  ;;  %v336_v21 = vld [vmem:[%s5403_s0 + $0x50] sm:$0xff] }
  0xe5   : > { %1692 = vperm.xlu1 %3166, %v336_v21  }
  0xe6   : > { %v812_v20 = vpop.f32.mrf.mxu3 }
  0xe7   : > { %v505_v35 = vpop.f32.mrf.mxu0  ;;  %v615_v41 = vpop.f32.mrf.mxu1 }
  0xe8   : > { %v616_v48 = vadd.f32 %v615_v41, %v497_v28  ;;  %v706_v52 = vpop.f32.mrf.mxu2 }
  0xea   : > { %v707_v37 = vadd.f32 %v706_v52, %v616_v48  ;;  %915 = vmatmul.f32.gmra.mxu0 %v3508_v14  ;;  %993 = vmatmul.f32.gmra.mxu1 %v3488_v0 }
  0xeb   : > { %1229 = vmatmul.f32.gmra.mxu3 %v3508_v14 }
  0xec   : > { %v3752_v32 = vadd.f32 %v812_v20, %v707_v37  ;;  %1115 = vmatmul.f32.gmra.mxu2 %v3543_v29  ;;  %v334_v29 = vld [vmem:[%s5403_s0 + $0x40] sm:$0xff] }
  0xed   : > { %1682 = vperm.xlu2 %3167, %v334_v29  }
  0xee   : > { %v818_v44 = vpop.f32.mrf.mxu3 }
  0xef   : > { %v513_v17 = vpop.f32.mrf.mxu0  ;;  %v619_v28 = vpop.f32.mrf.mxu1 }
  0xf0   : > { %v620_v55 = vadd.f32 %v619_v28, %v505_v35  ;;  %v711_v2 = vpop.f32.mrf.mxu2 }
  0xf2   : > { %v712_v10 = vadd.f32 %v711_v2, %v620_v55  ;;  %919 = vmatmul.f32.gmra.mxu0 %v3528_v23  ;;  %997 = vmatmul.f32.gmra.mxu1 %v3508_v14 }
  0xf3   : > { %1233 = vmatmul.f32.gmra.mxu3 %v3528_v23 }
  0xf4   : > { %v3761_v20 = vadd.f32 %v818_v44, %v712_v10  ;;  %1123 = vmatmul.f32.gmra.mxu2 %v3563_v40  ;;  %v338_v40 = vld [vmem:[%s5403_s0 + $0x60] sm:$0xff] }
  0xf5   : > { %1702 = vperm.xlu0 %3165, %v338_v40  }
  0xf6   : > { %v824_v41 = vpop.f32.mrf.mxu3 }
  0xf7   : > { %v521_v48 = vpop.f32.mrf.mxu0  ;;  %v623_v35 = vpop.f32.mrf.mxu1 }
  0xf8   : > { %v624_v52 = vadd.f32 %v623_v35, %v513_v17  ;;  %v716_v37 = vpop.f32.mrf.mxu2 }
  0xfa   : > { %v717_v21 = vadd.f32 %v716_v37, %v624_v52  ;;  %923 = vmatmul.f32.gmra.mxu0 %v3548_v31  ;;  %1001 = vmatmul.f32.gmra.mxu1 %v3528_v23 }
  0xfb   : > { %1237 = vmatmul.f32.gmra.mxu3 %v3548_v31 }
  0xfc   : > { %v3770_v44 = vadd.f32 %v824_v41, %v717_v21  ;;  %1131 = vmatmul.f32.gmra.mxu2 %v3583_v58  ;;  %v339_v58 = vld [vmem:[%s5403_s0 + $0x68] sm:$0xff] }
  0xfd   : > { %1707 = vperm.xlu1 %3166, %v339_v58  }
  0xfe   : > { %v830_v28 = vpop.f32.mrf.mxu3 }
  0xff   : > { %v529_v55 = vpop.f32.mrf.mxu0  ;;  %v627_v17 = vpop.f32.mrf.mxu1 }
 0x100   : > { %v628_v2 = vadd.f32 %v627_v17, %v521_v48  ;;  %v721_v10 = vpop.f32.mrf.mxu2 }
 0x102   : > { %v722_v29 = vadd.f32 %v721_v10, %v628_v2  ;;  %927 = vmatmul.f32.gmra.mxu0 %v3568_v45  ;;  %1005 = vmatmul.f32.gmra.mxu1 %v3548_v31 }
 0x103   : > { %1241 = vmatmul.f32.gmra.mxu3 %v3568_v45 }
 0x104   : > { %v3779_v41 = vadd.f32 %v830_v28, %v722_v29  ;;  %1139 = vmatmul.f32.gmra.mxu2 %v3603_v16  ;;  %v337_v16 = vld [vmem:[%s5403_s0 + $0x58] sm:$0xff] }
 0x105   : > { %1697 = vperm.xlu2 %3167, %v337_v16  }
 0x106   : > { %v836_v35 = vpop.f32.mrf.mxu3 }
 0x107   : > { %v537_v52 = vpop.f32.mrf.mxu0  ;;  %v631_v48 = vpop.f32.mrf.mxu1 }
 0x108   : > { %v632_v37 = vadd.f32 %v631_v48, %v529_v55  ;;  %v726_v21 = vpop.f32.mrf.mxu2 }
 0x10a   : > { %v727_v40 = vadd.f32 %v726_v21, %v632_v37  ;;  %931 = vmatmul.f32.gmra.mxu0 %v3588_v61  ;;  %1009 = vmatmul.f32.gmra.mxu1 %v3568_v45 }
 0x10b   : > { %1245 = vmatmul.f32.gmra.mxu3 %v3588_v61 }
 0x10c   : > { %v3788_v28 = vadd.f32 %v836_v35, %v727_v40  ;;  %1147 = vmatmul.f32.gmra.mxu2 %v3623_v38  ;;  %v341_v35 = vld [vmem:[%s5403_s0 + $0x78] sm:$0xff] }
 0x10d   : > { %1717 = vperm.xlu0 %3165, %v341_v35  }
 0x10e   : > { %v842_v17 = vpop.f32.mrf.mxu3 }
 0x10f   : > { %v545_v2 = vpop.f32.mrf.mxu0  ;;  %v635_v55 = vpop.f32.mrf.mxu1 }
 0x110   : > { %v636_v10 = vadd.f32 %v635_v55, %v537_v52  ;;  %v731_v29 = vpop.f32.mrf.mxu2 }
 0x112   : > { %v732_v58 = vadd.f32 %v731_v29, %v636_v10  ;;  %935 = vmatmul.f32.gmra.mxu0 %v3608_v24  ;;  %1013 = vmatmul.f32.gmra.mxu1 %v3588_v61 }
 0x113   : > { %1249 = vmatmul.f32.gmra.mxu3 %v3608_v24 }
 0x114   : > { %v3800_v38 = vadd.f32 %v842_v17, %v732_v58  ;;  %1155 = vmatmul.f32.gmra.mxu2 %v3643_v25 }
 0x116   : > { %v848_v48 = vpop.f32.mrf.mxu3 }
 0x117   : > { %v553_v37 = vpop.f32.mrf.mxu0  ;;  %v639_v52 = vpop.f32.mrf.mxu1 }
 0x118   : > { %v640_v21 = vadd.f32 %v639_v52, %v545_v2  ;;  %v736_v40 = vpop.f32.mrf.mxu2 }
 0x11a   : > { %v737_v16 = vadd.f32 %v736_v40, %v640_v21  ;;  %939 = vmatmul.f32.gmra.mxu0 %v3628_v51  ;;  %1017 = vmatmul.f32.gmra.mxu1 %v3608_v24 }
 0x11b   : > { %1253 = vmatmul.f32.gmra.mxu3 %v3628_v51 }
 0x11c   : > { %v3806_v55 = vadd.f32 %v848_v48, %v737_v16  ;;  %1163 = vmatmul.f32.gmra.mxu2 %v3659_v54  ;;  %v340_v54 = vld [vmem:[%s5403_s0 + $0x70] sm:$0xff]  ;;  %s3188_s0 = scalar_lea.hbm %s5331_s5, 4 }
 0x11d   : > { %1712 = vperm.xlu2 %3167, %v340_v54   ;;  %p3190_p2 = scmp.lt.s32.totalorder %s3188_s0, %s3184_s27 }
 0x11e   : > { %v854_v17 = vpop.f32.mrf.mxu3 }
 0x11f   : > { %v561_v10 = vpop.f32.mrf.mxu0  ;;  %v643_v29 = vpop.f32.mrf.mxu1  ;;  %p3191_p3 = por %p3190_p2, %p3189_p1 }
 0x120   : > { %v644_v25 = vadd.f32 %v643_v29, %v553_v37  ;;  %v741_v58 = vpop.f32.mrf.mxu2 }
 0x121   : > { %p3192_p5 = pnand %p3191_p3, %p3187_p0 }
 0x122   : > { %v742_v35 = vadd.f32 %v741_v58, %v644_v25  ;;  %943 = vmatmul.f32.gmra.mxu0 %v3648_v6  ;;  %1021 = vmatmul.f32.gmra.mxu1 %v3628_v51 }
 0x123   : > { %1257 = vmatmul.f32.gmra.mxu3 %v3648_v6 }
 0x124   : > { %v3812_v2 = vadd.f32 %v854_v17, %v742_v35  ;;  %1171 = vmatmul.f32.gmra.mxu2 %v3673_v47 }
 0x126   : > { %v860_v48 = vpop.f32.mrf.mxu3 }
 0x127   : > { %v647_v52 = vpop.f32.mrf.mxu1  ;;  %v884_v37 = vpop.f32.mrf.mxu0 }
 0x128   : > { %v648_v21 = vadd.f32 %v647_v52, %v561_v10  ;;  %v746_v40 = vpop.f32.mrf.mxu2 }
 0x12a   : > { %v747_v16 = vadd.f32 %v746_v40, %v648_v21  ;;  %1025 = vmatmul.f32.gmra.mxu1 %v3648_v6  ;;  %1281 = vmatmul.f32.vlgmr.msra.gmra.mxu0 %v3356_v4 }
 0x12b   : > { %1576 = vmatmul.f32.vlgmr.msra.gmra.mxu3 %v3352_v3 }
 0x12c   : > { %v3821_v17 = vadd.f32 %v860_v48, %v747_v16  ;;  %1494 = vmatmul.f32.vlgmr.msra.gmra.mxu2 %v3352_v3  ;;  %v3834_v3 = vpop.permute.xlu0 %1642 }
 0x12e   : > { %v1198_v47 = vpop.f32.mrf.mxu3 }
 0x12f   : > { %v888_v29 = vpop.f32.mrf.mxu0  ;;  %v966_v25 = vpop.f32.mrf.mxu1 }
 0x130   : > { %v1052_v58 = vpop.f32.mrf.mxu2 }
 0x131   : > { %v3824_v35 = vadd.f32 %v1198_v47, %v1052_v58 }
 0x132   : > { %1286 = vmatmul.f32.gmra.mxu0 %v3379_v12  ;;  %1380 = vmatmul.f32.vlgmr.msra.gmra.mxu1 %v3368_v7  ;;  %v885_v7 = vadd.f32 %v884_v37, %v3692_v9  ;;  %v3839_v12 = vpop.permute.xlu1 %1652 }
 0x133   : > { %1580 = vmatmul.f32.gmra.mxu3 %v3370_v8 }
 0x134   : > { %1498 = vmatmul.f32.gmra.mxu2 %v3370_v8  ;;  %v967_v8 = vadd.f32 %v966_v25, %v885_v7 }
 0x136   : > { %v1202_v4 = vpop.f32.mrf.mxu3 }
 0x137   : > { %v892_v10 = vpop.f32.mrf.mxu0  ;;  %v970_v54 = vpop.f32.mrf.mxu1 }
 0x138   : > { %v1060_v48 = vpop.f32.mrf.mxu2  ;;  %v893_v21 = vadd.f32 %v892_v10, %v3707_v36  ;;  %v3857_v36 = vpop.permute.xlu0 %1647 }
 0x139   : > { %v3830_v52 = vadd.f32 %v1202_v4, %v1060_v48 }
 0x13a   : > { %1291 = vmatmul.f32.gmra.mxu0 %v3399_v26  ;;  %1386 = vmatmul.f32.gmra.mxu1 %v3387_v18  ;;  %v3845_v18 = vsub.f32 %v3834_v3, %v967_v8  ;;  %v3860_v10 = vpop.permute.xlu1 %1657 }
 0x13b   : > { %1584 = vmatmul.f32.gmra.mxu3 %v3381_v13 }
 0x13c   : > { %1502 = vmatmul.f32.gmra.mxu2 %v3381_v13  ;;  %v889_v13 = vadd.f32 %v888_v29, %v3701_v15 }
 0x13e   : > { %v1206_v40 = vpop.f32.mrf.mxu3  ;;  %v971_v37 = vadd.f32 %v970_v54, %v889_v13 }
 0x13f   : > { %v896_v16 = vpop.f32.mrf.mxu0  ;;  %v974_v47 = vpop.f32.mrf.mxu1 }
 0x140   : > { %v975_v58 = vadd.f32 %v974_v47, %v893_v21  ;;  %v1068_v26 = vpop.f32.mrf.mxu2  ;;  %v897_v25 = vadd.f32 %v896_v16, %v3713_v30  ;;  %v3865_v15 = vsub.f32 %v3857_v36, %v971_v37  ;;  %v3876_v30 = vpop.permute.xlu2 %1662 }
 0x141   : > { %v3842_v4 = vadd.f32 %v1206_v40, %v1068_v26 }
 0x142   : > { %v3848_v48 = vsub.f32 %v3839_v12, %v975_v58  ;;  %1296 = vmatmul.f32.gmra.mxu0 %v3418_v39  ;;  %1392 = vmatmul.f32.gmra.mxu1 %v3406_v33 }
 0x143   : > { %1588 = vmatmul.f32.gmra.mxu3 %v3408_v34 }
 0x144   : > { %v1752_v9 = vmin.f32 %v3845_v18, %v3848_v48  ;;  %1506 = vmatmul.f32.gmra.mxu2 %v3408_v34 }
 0x146   : > { %v1210_v7 = vpop.f32.mrf.mxu3 }
 0x147   : > { %v900_v39 = vpop.f32.mrf.mxu0  ;;  %v978_v8 = vpop.f32.mrf.mxu1 }
 0x148   : > { %v979_v33 = vadd.f32 %v978_v8, %v897_v25  ;;  %v1076_v21 = vpop.f32.mrf.mxu2  ;;  %v901_v54 = vadd.f32 %v900_v39, %v3722_v59  ;;  %v3890_v59 = vpop.permute.xlu2 %1667 }
 0x149   : > { %v3862_v40 = vadd.f32 %v1210_v7, %v1076_v21 }
 0x14a   : > { %v3868_v29 = vsub.f32 %v3860_v10, %v979_v33  ;;  %1301 = vmatmul.f32.gmra.mxu0 %v3438_v46  ;;  %1398 = vmatmul.f32.gmra.mxu1 %v3426_v42 }
 0x14b   : > { %1592 = vmatmul.f32.gmra.mxu3 %v3428_v43 }
 0x14c   : > { %v1753_v34 = vmin.f32 %v3865_v15, %v3868_v29  ;;  %1510 = vmatmul.f32.gmra.mxu2 %v3428_v43 }
 0x14e   : > { %v1214_v16 = vpop.f32.mrf.mxu3 }
 0x14f   : > { %v904_v47 = vpop.f32.mrf.mxu0  ;;  %v982_v58 = vpop.f32.mrf.mxu1 }
 0x150   : > { %v905_v26 = vadd.f32 %v904_v47, %v3734_v62  ;;  %v983_v13 = vadd.f32 %v982_v58, %v901_v54  ;;  %v1084_v46 = vpop.f32.mrf.mxu2 }
 0x151   : > { %v3880_v37 = vadd.f32 %v1214_v16, %v1084_v46 }
 0x152   : > { %v3883_v42 = vsub.f32 %v3876_v30, %v983_v13  ;;  %1306 = vmatmul.f32.gmra.mxu0 %v3458_v53  ;;  %1404 = vmatmul.f32.gmra.mxu1 %v3446_v49 }
 0x153   : > { %1596 = vmatmul.f32.gmra.mxu3 %v3448_v50 }
 0x154   : > { %v1754_v43 = vmin.f32 %v1752_v9, %v3883_v42  ;;  %1514 = vmatmul.f32.gmra.mxu2 %v3448_v50  ;;  %v3903_v50 = vpop.permute.xlu0 %1672 }
 0x156   : > { %v1218_v62 = vpop.f32.mrf.mxu3 }
 0x157   : > { %v908_v25 = vpop.f32.mrf.mxu0  ;;  %v986_v7 = vpop.f32.mrf.mxu1 }
 0x158   : > { %v909_v39 = vadd.f32 %v908_v25, %v3743_v1  ;;  %v987_v8 = vadd.f32 %v986_v7, %v905_v26  ;;  %v1092_v33 = vpop.f32.mrf.mxu2 }
 0x159   : > { %v3893_v21 = vadd.f32 %v1218_v62, %v1092_v33 }
 0x15a   : > { %v3896_v53 = vsub.f32 %v3890_v59, %v987_v8  ;;  %1311 = vmatmul.f32.gmra.mxu0 %v3478_v60  ;;  %1410 = vmatmul.f32.gmra.mxu1 %v3466_v56  ;;  %v3916_v60 = vpop.permute.xlu1 %1677 }
 0x15b   : > { %1600 = vmatmul.f32.gmra.mxu3 %v3468_v57 }
 0x15c   : > { %v1755_v49 = vmin.f32 %v1753_v34, %v3896_v53  ;;  %1518 = vmatmul.f32.gmra.mxu2 %v3468_v57 }
 0x15e   : > { %v1222_v1 = vpop.f32.mrf.mxu3 }
 0x15f   : > { %v912_v9 = vpop.f32.mrf.mxu0  ;;  %v990_v54 = vpop.f32.mrf.mxu1 }
 0x160   : > { %v991_v16 = vadd.f32 %v990_v54, %v909_v39  ;;  %v1100_v47 = vpop.f32.mrf.mxu2  ;;  %v913_v57 = vadd.f32 %v912_v9, %v3752_v32  ;;  %v3929_v32 = vpop.permute.xlu2 %1682 }
 0x161   : > { %v3905_v58 = vadd.f32 %v1222_v1, %v1100_v47  ;;  %5404 = vst [vmem:[#allocation19_spill] sm:$0xff] %v3929_v32 }
 0x162   : > { %v3908_v26 = vsub.f32 %v3903_v50, %v991_v16  ;;  %1316 = vmatmul.f32.gmra.mxu0 %v3498_v5  ;;  %1416 = vmatmul.f32.gmra.mxu1 %v3486_v63 }
 0x163   : > { %1604 = vmatmul.f32.gmra.mxu3 %v3488_v0 }
 0x164   : > { %v1756_v56 = vmin.f32 %v1754_v43, %v3908_v26  ;;  %1522 = vmatmul.f32.gmra.mxu2 %v3488_v0 }
 0x166   : > { %v1226_v34 = vpop.f32.mrf.mxu3 }
 0x167   : > { %v916_v13 = vpop.f32.mrf.mxu0  ;;  %v994_v46 = vpop.f32.mrf.mxu1 }
 0x168   : > { %v995_v62 = vadd.f32 %v994_v46, %v913_v57  ;;  %v1108_v25 = vpop.f32.mrf.mxu2  ;;  %v917_v0 = vadd.f32 %v916_v13, %v3761_v20  ;;  %v3944_v20 = vpop.permute.xlu0 %1687  ;;  %v5409_v57 = vld [vmem:[#allocation6_spill] sm:$0xff] }
 0x169   : > { %v3918_v7 = vadd.f32 %v1226_v34, %v1108_v25  ;;  %5407 = vst [vmem:[#allocation22_spill] sm:$0xff] %v3944_v20 }
 0x16a   : > { %v3921_v5 = vsub.f32 %v3916_v60, %v995_v62  ;;  %1321 = vmatmul.f32.gmra.mxu0 %v3518_v19  ;;  %1422 = vmatmul.f32.gmra.mxu1 %v3506_v11 }
 0x16b   : > { %1608 = vmatmul.f32.gmra.mxu3 %v3508_v14 }
 0x16c   : > { %v1757_v63 = vmin.f32 %v1755_v49, %v3921_v5  ;;  %1526 = vmatmul.f32.gmra.mxu2 %v3508_v14 }
 0x16e   : > { %v3931_v43 = vpop.f32.mrf.mxu3 }
 0x16f   : > { %5405 = vst [vmem:[#allocation20_spill] sm:$0xff] %v3931_v43  ;;  %v920_v39 = vpop.f32.mrf.mxu0  ;;  %v998_v8 = vpop.f32.mrf.mxu1 }
 0x170   : > { %v999_v33 = vadd.f32 %v998_v8, %v917_v0  ;;  %v3933_v1 = vpop.f32.mrf.mxu2  ;;  %v921_v14 = vadd.f32 %v920_v39, %v3770_v44  ;;  %v5413_v39 = vld [vmem:[#allocation9_spill] sm:$0xff]  ;;  %v5414_v8 = vld [vmem:[#allocation8_spill] sm:$0xff] }
 0x171   : > { %5406 = vst [vmem:[#allocation21_spill] sm:$0xff] %v3933_v1 }
 0x172   : > { %v3936_v19 = vsub.f32 %v3929_v32, %v999_v33  ;;  %1326 = vmatmul.f32.gmra.mxu0 %v3538_v27  ;;  %1428 = vmatmul.f32.gmra.mxu1 %v3526_v22  ;;  %v5408_v22 = vld [vmem:[#allocation7_spill] sm:$0xff] }
 0x173   : > { %1612 = vmatmul.f32.gmra.mxu3 %v3528_v23 }
 0x174   : > { %v1758_v11 = vmin.f32 %v1756_v56, %v3936_v19  ;;  %1530 = vmatmul.f32.gmra.mxu2 %v3528_v23  ;;  %v3959_v56 = vpop.permute.xlu1 %1692 }
 0x175   : > { %5410 = vst [vmem:[#allocation7_spill] sm:$0xff] %v3959_v56 }
 0x176   : > { %v3946_v49 = vpop.f32.mrf.mxu3 }
 0x177   : > { %v924_v9 = vpop.f32.mrf.mxu0  ;;  %v1002_v54 = vpop.f32.mrf.mxu1 }
 0x178   : > { %v1003_v16 = vadd.f32 %v1002_v54, %v921_v14  ;;  %v3948_v47 = vpop.f32.mrf.mxu2  ;;  %v925_v44 = vadd.f32 %v924_v9, %v3779_v41 }
 0x17a   : > { %v3951_v27 = vsub.f32 %v3944_v20, %v1003_v16  ;;  %1331 = vmatmul.f32.gmra.mxu0 %v5408_v22  ;;  %1434 = vmatmul.f32.gmra.mxu1 %v5409_v57 }
 0x17b   : > { %1616 = vmatmul.f32.gmra.mxu3 %v3548_v31 }
 0x17c   : > { %v1759_v23 = vmin.f32 %v1757_v63, %v3951_v27  ;;  %1534 = vmatmul.f32.gmra.mxu2 %v3548_v31  ;;  %v3974_v63 = vpop.permute.xlu2 %1697 }
 0x17d   : > { %5415 = vst [vmem:[#allocation9_spill] sm:$0xff] %v3974_v63 }
 0x17e   : > { %v3961_v34 = vpop.f32.mrf.mxu3 }
 0x17f   : > { %5411 = vst [vmem:[#allocation6_spill] sm:$0xff] %v3961_v34  ;;  %v928_v13 = vpop.f32.mrf.mxu0  ;;  %v1006_v46 = vpop.f32.mrf.mxu1 }
 0x180   : > { %v1007_v62 = vadd.f32 %v1006_v46, %v925_v44  ;;  %v3963_v25 = vpop.f32.mrf.mxu2  ;;  %v929_v41 = vadd.f32 %v928_v13, %v3788_v28  ;;  %v5417_v44 = vld [vmem:[#allocation11_spill] sm:$0xff]  ;;  %v5418_v46 = vld [vmem:[#allocation10_spill] sm:$0xff] }
 0x181   : > { %5412 = vst [vmem:[#allocation23_spill] sm:$0xff] %v3963_v25 }
 0x182   : > { %v3966_v0 = vsub.f32 %v3959_v56, %v1007_v62  ;;  %1336 = vmatmul.f32.gmra.mxu0 %v5413_v39  ;;  %1440 = vmatmul.f32.gmra.mxu1 %v5414_v8 }
 0x183   : > { %1620 = vmatmul.f32.gmra.mxu3 %v3568_v45 }
 0x184   : > { %v1760_v31 = vmin.f32 %v1758_v11, %v3966_v0  ;;  %1538 = vmatmul.f32.gmra.mxu2 %v3568_v45  ;;  %v3987_v11 = vpop.permute.xlu0 %1702 }
 0x185   : > { %5419 = vst [vmem:[#allocation11_spill] sm:$0xff] %v3987_v11 }
 0x186   : > { %v1242_v33 = vpop.f32.mrf.mxu3 }
 0x187   : > { %v932_v14 = vpop.f32.mrf.mxu0  ;;  %v1010_v9 = vpop.f32.mrf.mxu1 }
 0x188   : > { %v1011_v54 = vadd.f32 %v1010_v9, %v929_v41  ;;  %v1140_v16 = vpop.f32.mrf.mxu2  ;;  %v933_v28 = vadd.f32 %v932_v14, %v3800_v38 }
 0x189   : > { %v3976_v22 = vadd.f32 %v1242_v33, %v1140_v16  ;;  %v5422_v16 = vld [vmem:[#allocation12_spill] sm:$0xff] }
 0x18a   : > { %v3979_v57 = vsub.f32 %v3974_v63, %v1011_v54  ;;  %1341 = vmatmul.f32.gmra.mxu0 %v5417_v44  ;;  %1446 = vmatmul.f32.gmra.mxu1 %v5418_v46  ;;  %v5421_v54 = vld [vmem:[#allocation13_spill] sm:$0xff] }
 0x18b   : > { %5416 = vst [vmem:[#allocation8_spill] sm:$0xff] %v3976_v22  ;;  %1624 = vmatmul.f32.gmra.mxu3 %v3588_v61 }
 0x18c   : > { %v1761_v45 = vmin.f32 %v1759_v23, %v3979_v57  ;;  %1542 = vmatmul.f32.gmra.mxu2 %v3588_v61  ;;  %v4000_v23 = vpop.permute.xlu1 %1707 }
 0x18d   : > { %5423 = vst [vmem:[#allocation13_spill] sm:$0xff] %v4000_v23 }
 0x18e   : > { %v1246_v13 = vpop.f32.mrf.mxu3 }
 0x18f   : > { %v936_v62 = vpop.f32.mrf.mxu0  ;;  %v1014_v39 = vpop.f32.mrf.mxu1 }
 0x190   : > { %v1015_v8 = vadd.f32 %v1014_v39, %v933_v28  ;;  %v1148_v41 = vpop.f32.mrf.mxu2  ;;  %v937_v38 = vadd.f32 %v936_v62, %v3806_v55 }
 0x191   : > { %v3989_v33 = vadd.f32 %v1246_v13, %v1148_v41  ;;  %v5425_v41 = vld [vmem:[#allocation15_spill] sm:$0xff] }
 0x192   : > { %v3992_v9 = vsub.f32 %v3987_v11, %v1015_v8  ;;  %1346 = vmatmul.f32.gmra.mxu0 %v5421_v54  ;;  %1452 = vmatmul.f32.gmra.mxu1 %v5422_v16  ;;  %v5426_v54 = vld [vmem:[#allocation14_spill] sm:$0xff] }
 0x193   : > { %5420 = vst [vmem:[#allocation10_spill] sm:$0xff] %v3989_v33  ;;  %1628 = vmatmul.f32.gmra.mxu3 %v3608_v24 }
 0x194   : > { %v1762_v61 = vmin.f32 %v1760_v31, %v3992_v9  ;;  %1546 = vmatmul.f32.gmra.mxu2 %v3608_v24  ;;  %v4013_v31 = vpop.permute.xlu2 %1712 }
 0x195   : > { %5427 = vst [vmem:[#allocation15_spill] sm:$0xff] %v4013_v31 }
 0x196   : > { %v1250_v14 = vpop.f32.mrf.mxu3 }
 0x197   : > { %v940_v44 = vpop.f32.mrf.mxu0  ;;  %v1018_v46 = vpop.f32.mrf.mxu1 }
 0x198   : > { %v1019_v28 = vadd.f32 %v1018_v46, %v937_v38  ;;  %v1156_v13 = vpop.f32.mrf.mxu2  ;;  %v941_v55 = vadd.f32 %v940_v44, %v3812_v2 }
 0x199   : > { %v4002_v39 = vadd.f32 %v1250_v14, %v1156_v13 }
 0x19a   : > { %v4005_v8 = vsub.f32 %v4000_v23, %v1019_v28  ;;  %1351 = vmatmul.f32.gmra.mxu0 %v5425_v41  ;;  %1458 = vmatmul.f32.gmra.mxu1 %v5426_v54  ;;  %v5429_v41 = vld [vmem:[#allocation17_spill] sm:$0xff]  ;;  %v5430_v54 = vld [vmem:[#allocation16_spill] sm:$0xff] }
 0x19b   : > { %5424 = vst [vmem:[#allocation12_spill] sm:$0xff] %v4002_v39  ;;  %1632 = vmatmul.f32.gmra.mxu3 %v3628_v51 }
 0x19c   : > { %v1763_v24 = vmin.f32 %v1761_v45, %v4005_v8  ;;  %1550 = vmatmul.f32.gmra.mxu2 %v3628_v51  ;;  %v4026_v45 = vpop.permute.xlu0 %1717 }
 0x19d   : > { %5431 = vst [vmem:[#allocation17_spill] sm:$0xff] %v4026_v45 }
 0x19e   : > { %v1254_v62 = vpop.f32.mrf.mxu3 }
 0x19f   : > { %v944_v16 = vpop.f32.mrf.mxu0  ;;  %v1022_v38 = vpop.f32.mrf.mxu1 }
 0x1a0   : > { %v1023_v14 = vadd.f32 %v1022_v38, %v941_v55  ;;  %v1164_v46 = vpop.f32.mrf.mxu2  ;;  %v945_v2 = vadd.f32 %v944_v16, %v3821_v17 }
 0x1a1   : > { %v4015_v28 = vadd.f32 %v1254_v62, %v1164_v46 }
 0x1a2   : > { %v4018_v13 = vsub.f32 %v4013_v31, %v1023_v14  ;;  %1356 = vmatmul.f32.gmra.mxu0 %v5429_v41  ;;  %1464 = vmatmul.f32.gmra.mxu1 %v5430_v54  ;;  %v5433_v31 = vld [vmem:[#allocation18_spill] sm:$0xff] }
 0x1a3   : > { %5428 = vst [vmem:[#allocation14_spill] sm:$0xff] %v4015_v28  ;;  %1636 = vmatmul.f32.gmra.mxu3 %v3648_v6 }
 0x1a4   : > { %v1764_v51 = vmin.f32 %v1762_v61, %v4018_v13  ;;  %1554 = vmatmul.f32.gmra.mxu2 %v3648_v6 }
 0x1a6   : > { %v1258_v44 = vpop.f32.mrf.mxu3 }
 0x1a7   : > { %v1026_v55 = vpop.f32.mrf.mxu1  ;;  %v1282_v62 = vpop.f32.mrf.mxu0 }
 0x1a8   : > { %v1027_v38 = vadd.f32 %v1026_v55, %v945_v2  ;;  %v1283_v14 = vadd.f32 %v1282_v62, %v3824_v35  ;;  %v1172_v46 = vpop.f32.mrf.mxu2  ;;  %v5354_v62 = vlaneseq }
 0x1a9   : > { %v4029_v41 = vadd.f32 %v1258_v44, %v1172_v46 }
 0x1aa   : > { %v4032_v54 = vsub.f32 %v4026_v45, %v1027_v38  ;;  %1470 = vmatmul.f32.gmra.mxu1 %v5433_v31  ;;  %v4038_v45 = vshrl.u32 %v5354_v62, 7 }
 0x1ab   : > { %5432 = vst [vmem:[#allocation16_spill] sm:$0xff] %v4029_v41 }
 0x1ac   : > { %v1765_v6 = vmin.f32 %v1763_v24, %v4032_v54  ;;  %v4125_v62 = vadd.s32 96, %v4038_v45  ;;  %v4134_v63 = vadd.s32 120, %v4038_v45 }
 0x1ae   : > { %v1766_v61 = vmin.f32 %v1764_v51, %v1765_v6  ;;  %v1577_v17 = vpop.f32.mrf.mxu3 }
 0x1af   : > { %v1287_v16 = vpop.f32.mrf.mxu0  ;;  %v1381_v23 = vpop.f32.mrf.mxu1 }
 0x1b0   : > { %v1767_v28 = vrot.slane %v1766_v61, 4  ;;  %v1288_v11 = vadd.f32 %v1287_v16, %v3830_v52  ;;  %v1382_v2 = vadd.f32 %v1381_v23, %v1283_v14  ;;  %v1495_v55 = vpop.f32.mrf.mxu2  ;;  %v4044_v23 = vadd.s32 8, %v4038_v45 }
 0x1b1   : > { %v4047_v14 = vadd.s32 16, %v4038_v45  ;;  %v4056_v16 = vadd.s32 40, %v4038_v45 }
 0x1b2   : > { %v1768_v35 = vmin.f32 %v1766_v61, %v1767_v28  ;;  %v1496_v44 = vadd.f32 %v1495_v55, %v1382_v2  ;;  %v4050_v61 = vadd.s32 24, %v4038_v45  ;;  %v4094_v2 = vadd.s32 56, %v4038_v45 }
 0x1b3   : > { %v4097_v55 = vadd.s32 64, %v4038_v45 }
 0x1b4   : > { %v1769_v46 = vrot.slane %v1768_v35, 2  ;;  %v1578_v41 = vadd.f32 %v1577_v17, %v1496_v44  ;;  %v4053_v17 = vadd.s32 32, %v4038_v45 }
 0x1b6   : > { %v1770_v38 = vmin.f32 %v1768_v35, %v1769_v46  ;;  %v1581_v31 = vpop.f32.mrf.mxu3  ;;  %v4100_v35 = vadd.s32 72, %v4038_v45  ;;  %v4141_v33 = vsub.f32 %v3834_v3, %v1578_v41 }
 0x1b7   : > { %v1292_v24 = vpop.f32.mrf.mxu0  ;;  %v1387_v51 = vpop.f32.mrf.mxu1 }
 0x1b8   : > { %v1771_v6 = vrot.slane %v1770_v38, 1  ;;  %v1293_v39 = vadd.f32 %v1292_v24, %v3842_v4  ;;  %v1388_v56 = vadd.f32 %v1387_v51, %v1288_v11  ;;  %v1499_v32 = vpop.f32.mrf.mxu2  ;;  %v4091_v11 = vadd.s32 48, %v4038_v45  ;;  %5434 = vst [vmem:[#allocation18_spill] sm:$0xff] %v4141_v33 }
 0x1ba   : > { %v4041_v52 = vmin.f32 %v1770_v38, %v1771_v6  ;;  %v1500_v28 = vadd.f32 %v1499_v32, %v1388_v56  ;;  %v4119_v6 = vadd.s32 80, %v4038_v45 }
 0x1bc   : > { %vm1811_vm2 = vcmp.le.f32.partialorder %v3845_v18, %v4041_v52  ;;  %vm1813_vm3 = vcmp.le.f32.partialorder %v3865_v15, %v4041_v52  ;;  %vm1815_vm4 = vcmp.le.f32.partialorder %v3848_v48, %v4041_v52  ;;  %vm1817_vm5 = vcmp.le.f32.partialorder %v3868_v29, %v4041_v52 }
 0x1bd   : > { %vm1819_vm6 = vcmp.le.f32.partialorder %v3883_v42, %v4041_v52  ;;  %vm1821_vm7 = vcmp.le.f32.partialorder %v3896_v53, %v4041_v52  ;;  %vm1823_vm8 = vcmp.le.f32.partialorder %v3908_v26, %v4041_v52  ;;  %vm1825_vm9 = vcmp.le.f32.partialorder %v3921_v5, %v4041_v52 }
 0x1be   : > { %vm1827_vm10 = vcmp.le.f32.partialorder %v3936_v19, %v4041_v52  ;;  %vm1829_vm11 = vcmp.le.f32.partialorder %v3951_v27, %v4041_v52  ;;  %vm1831_vm12 = vcmp.le.f32.partialorder %v3966_v0, %v4041_v52  ;;  %vm1833_vm13 = vcmp.le.f32.partialorder %v3979_v57, %v4041_v52  ;;  %v1585_v4 = vpop.f32.mrf.mxu3 }
 0x1bf   : > { %vm1835_vm14 = vcmp.le.f32.partialorder %v3992_v9, %v4041_v52  ;;  %vm1837_vm15 = vcmp.le.f32.partialorder %v4005_v8, %v4041_v52  ;;  %vm1839_vm0 = vcmp.le.f32.partialorder %v4018_v13, %v4041_v52  ;;  %vm1841_vm1 = vcmp.le.f32.partialorder %v4032_v54, %v4041_v52  ;;  %v1297_v32 = vpop.f32.mrf.mxu0  ;;  %v1393_v56 = vpop.f32.mrf.mxu1 }
 0x1c0   : > { %v1503_v44 = vpop.f32.mrf.mxu2  ;;  %v1843_v46 = vsel %vm1811_vm2, %v4038_v45, 128  ;;  %v1845_v38 = vsel %vm1813_vm3, %v4044_v23, 128  ;;  %v1847_v24 = vsel %vm1815_vm4, %v4047_v14, 128  ;;  %v1849_v51 = vsel %vm1817_vm5, %v4050_v61, 128 }
 0x1c1   : > { %v4122_v18 = vadd.s32 88, %v4038_v45  ;;  %v4128_v15 = vadd.s32 104, %v4038_v45  ;;  %v4131_v48 = vadd.s32 112, %v4038_v45  ;;  %v1851_v29 = vsel %vm1819_vm6, %v4053_v17, 128 }
 0x1c2   : > { %vm1875_vm2 = vcmp.lt.s32.totalorder %v1843_v46, %v1847_v24  ;;  %vm1877_vm3 = vcmp.lt.s32.totalorder %v1845_v38, %v1849_v51  ;;  %v1582_v20 = vadd.f32 %v1581_v31, %v1500_v28  ;;  %v1298_v22 = vadd.f32 %v1297_v32, %v3862_v40 }
 0x1c3   : > { %v1853_v34 = vsel %vm1821_vm7, %v4056_v16, 128  ;;  %v1876_v25 = vsel %vm1875_vm2, %v1843_v46, %v1847_v24  ;;  %v1878_v43 = vsel %vm1877_vm3, %v1845_v38, %v1849_v51  ;;  %v1394_v1 = vadd.f32 %v1393_v56, %v1293_v39 }
 0x1c4   : > { %v1855_v42 = vsel %vm1823_vm8, %v4091_v11, 128  ;;  %v1857_v3 = vsel %vm1825_vm9, %v4094_v2, 128  ;;  %vm1879_vm4 = vcmp.lt.s32.totalorder %v1876_v25, %v1851_v29  ;;  %vm1881_vm5 = vcmp.lt.s32.totalorder %v1878_v43, %v1853_v34 }
 0x1c5   : > { %v1859_v53 = vsel %vm1827_vm10, %v4097_v55, 128  ;;  %v1880_v41 = vsel %vm1879_vm4, %v1876_v25, %v1851_v29  ;;  %v1882_v39 = vsel %vm1881_vm5, %v1878_v43, %v1853_v34  ;;  %v1504_v31 = vadd.f32 %v1503_v44, %v1394_v1 }
 0x1c6   : > { %v1589_v40 = vpop.f32.mrf.mxu3  ;;  %vm1883_vm6 = vcmp.lt.s32.totalorder %v1880_v41, %v1855_v42  ;;  %vm1885_vm7 = vcmp.lt.s32.totalorder %v1882_v39, %v1857_v3  ;;  %v1861_v46 = vsel %vm1829_vm11, %v4100_v35, 128  ;;  %v1863_v43 = vsel %vm1831_vm12, %v4119_v6, 128 }
 0x1c7   : > { %v1302_v28 = vpop.f32.mrf.mxu0  ;;  %v1399_v32 = vpop.f32.mrf.mxu1  ;;  %v1884_v38 = vsel %vm1883_vm6, %v1880_v41, %v1855_v42  ;;  %v1886_v24 = vsel %vm1885_vm7, %v1882_v39, %v1857_v3  ;;  %v1586_v19 = vadd.f32 %v1585_v4, %v1504_v31  ;;  %v1869_v4 = vsel %vm1837_vm15, %v4128_v15, 128 }
 0x1c8   : > { %v1303_v26 = vadd.f32 %v1302_v28, %v3880_v37  ;;  %v1400_v56 = vadd.f32 %v1399_v32, %v1298_v22  ;;  %v1507_v5 = vpop.f32.mrf.mxu2  ;;  %vm1887_vm8 = vcmp.lt.s32.totalorder %v1884_v38, %v1859_v53  ;;  %vm1889_vm9 = vcmp.lt.s32.totalorder %v1886_v24, %v1861_v46 }
 0x1c9   : > { %v1865_v37 = vsel %vm1833_vm13, %v4122_v18, 128  ;;  %v1888_v34 = vsel %vm1887_vm8, %v1884_v38, %v1859_v53  ;;  %v1890_v25 = vsel %vm1889_vm9, %v1886_v24, %v1861_v46  ;;  %v4174_v27 = vsub.f32 %v3839_v12, %v1586_v19 }
 0x1ca   : > { %v1508_v1 = vadd.f32 %v1507_v5, %v1400_v56  ;;  %v1867_v22 = vsel %vm1835_vm14, %v4125_v62, 128  ;;  %vm1891_vm10 = vcmp.lt.s32.totalorder %v1888_v34, %v1863_v43  ;;  %vm1893_vm11 = vcmp.lt.s32.totalorder %v1890_v25, %v1865_v37 }
 0x1cb   : > { %5435 = vst [vmem:[#allocation24_spill] sm:$0xff] %v4174_v27  ;;  %v1892_v57 = vsel %vm1891_vm10, %v1888_v34, %v1863_v43  ;;  %v1894_v44 = vsel %vm1893_vm11, %v1890_v25, %v1865_v37  ;;  %v1773_v51 = vmin.f32 %v4141_v33, %v4174_v27  ;;  %v4187_v12 = vsub.f32 %v3857_v36, %v1582_v20 }
 0x1cc   : > { %v1590_v0 = vadd.f32 %v1589_v40, %v1508_v1  ;;  %vm1895_vm12 = vcmp.lt.s32.totalorder %v1892_v57, %v1867_v22  ;;  %vm1897_vm13 = vcmp.lt.s32.totalorder %v1894_v44, %v1869_v4  ;;  %v1871_v8 = vsel %vm1839_vm0, %v4131_v48, 128 }
 0x1cd   : > { %5436 = vst [vmem:[#allocation25_spill] sm:$0xff] %v4187_v12  ;;  %v1873_v42 = vsel %vm1841_vm1, %v4134_v63, 128  ;;  %v1896_v3 = vsel %vm1895_vm12, %v1892_v57, %v1867_v22  ;;  %v1898_v40 = vsel %vm1897_vm13, %v1894_v44, %v1869_v4 }
 0x1ce   : > { %v4190_v9 = vsub.f32 %v3860_v10, %v1590_v0  ;;  %v1593_v29 = vpop.f32.mrf.mxu3  ;;  %vm1899_vm14 = vcmp.lt.s32.totalorder %v1896_v3, %v1871_v8  ;;  %vm1901_vm15 = vcmp.lt.s32.totalorder %v1898_v40, %v1873_v42 }
 0x1cf   : > { %v1307_v53 = vpop.f32.mrf.mxu0  ;;  %v1405_v41 = vpop.f32.mrf.mxu1  ;;  %v1900_v39 = vsel %vm1899_vm14, %v1896_v3, %v1871_v8  ;;  %v1902_v13 = vsel %vm1901_vm15, %v1898_v40, %v1873_v42 }
 0x1d0   : > { %5437 = vst [vmem:[#allocation26_spill] sm:$0xff] %v4190_v9  ;;  %v1774_v36 = vmin.f32 %v4187_v12, %v4190_v9  ;;  %v1308_v10 = vadd.f32 %v1307_v53, %v3893_v21  ;;  %v1511_v20 = vpop.f32.mrf.mxu2  ;;  %v1406_v31 = vadd.f32 %v1405_v41, %v1303_v26  ;;  %vm1903_vm0 = vcmp.lt.s32.totalorder %v1900_v39, %v1902_v13  ;;  %v5444_v9 = vld [vmem:[#allocation6_spill] sm:$0xff] }
 0x1d1   : > { %v1904_v28 = vsel %vm1903_vm0, %v1900_v39, %v1902_v13 }
 0x1d2   : > { %v1512_v32 = vadd.f32 %v1511_v20, %v1406_v31  ;;  %v1905_v54 = vrot.slane %v1904_v28, 4 }
 0x1d4   : > { %v1594_v52 = vadd.f32 %v1593_v29, %v1512_v32  ;;  %vm1906_vm1 = vcmp.lt.s32.totalorder %v1904_v28, %v1905_v54  ;;  %v5379_v29 = vmov 1.0  }
 0x1d5   : > { %v1907_v5 = vsel %vm1906_vm1, %v1904_v28, %v1905_v54 }
 0x1d6   : > { %v1597_v56 = vpop.f32.mrf.mxu3  ;;  %v4204_v46 = vsub.f32 %v3876_v30, %v1594_v52  ;;  %v1908_v19 = vrot.slane %v1907_v5, 2 }
 0x1d7   : > { %v1312_v38 = vpop.f32.mrf.mxu0  ;;  %v1411_v24 = vpop.f32.mrf.mxu1 }
 0x1d8   : > { %5438 = vst [vmem:[#allocation27_spill] sm:$0xff] %v4204_v46  ;;  %v1313_v21 = vadd.f32 %v1312_v38, %v3905_v58  ;;  %v1412_v43 = vadd.f32 %v1411_v24, %v1308_v10  ;;  %v1515_v1 = vpop.f32.mrf.mxu2  ;;  %v4208_v26 = vmin.f32 %v1773_v51, %v4204_v46  ;;  %vm1909_vm2 = vcmp.lt.s32.totalorder %v1907_v5, %v1908_v19  ;;  %v5443_v46 = vld [vmem:[#allocation23_spill] sm:$0xff] }
 0x1d9   : > { %v1910_v34 = vsel %vm1909_vm2, %v1907_v5, %v1908_v19  ;;  %v1239_v27 = vadd.f32 %v5444_v9, %v5443_v46 }
 0x1da   : > { %v1516_v37 = vadd.f32 %v1515_v1, %v1412_v43  ;;  %v1911_v25 = vrot.slane %v1910_v34, 1 }
 0x1dc   : > { %v1598_v22 = vadd.f32 %v1597_v56, %v1516_v37  ;;  %vm1912_vm3 = vcmp.lt.s32.totalorder %v1910_v34, %v1911_v25 }
 0x1dd   : > { %v4213_v4 = vsel %vm1912_vm3, %v1910_v34, %v1911_v25 }
 0x1de   : > { %v4211_v0 = vsub.f32 %v3890_v59, %v1598_v22  ;;  %v1601_v30 = vpop.f32.mrf.mxu3  ;;  %vm1983_vm4 = vcmp.eq.s32.totalorder %v4134_v63, %v4213_v4  ;;  %vm1981_vm5 = vcmp.eq.s32.totalorder %v4131_v48, %v4213_v4  ;;  %v5368_v59 = vmov 0.0  }
 0x1df   : > { %v1317_v57 = vpop.f32.mrf.mxu0  ;;  %v1417_v44 = vpop.f32.mrf.mxu1  ;;  %3005 = vmatpush.msk.msrb.mxu0 %vm1983_vm4, %v5379_v29  ;;  %3021 = vmatpush.msk.msrb.mxu3 %vm1983_vm4, %v5379_v29  ;;  %v3003_v8 = vsel %vm1983_vm4, 1.0, %v5368_v59  ;;  %vm1979_vm6 = vcmp.eq.s32.totalorder %v4128_v15, %v4213_v4  ;;  %v3001_v3 = vsel %vm1981_vm5, 1.0, %v5368_v59  ;;  %vm1977_vm7 = vcmp.eq.s32.totalorder %v4125_v62, %v4213_v4 }
 0x1e0   : > { %5439 = vst [vmem:[#allocation28_spill] sm:$0xff] %v4211_v0  ;;  %v4216_v58 = vmin.f32 %v1774_v36, %v4211_v0  ;;  %v1519_v51 = vpop.f32.mrf.mxu2  ;;  %v1418_v42 = vadd.f32 %v1417_v44, %v1313_v21  ;;  %v4240_v40 = vsub.f32 %v3003_v8, %v3003_v8  ;;  %v4242_v53 = vsub.f32 %v3001_v3, %v3001_v3 }
 0x1e1   : > { %v2999_v41 = vsel %vm1979_vm6, 1.0, %v5368_v59  ;;  %3006 = vmatpush.msk.msrb.mxu0 %vm1981_vm5, %v5379_v29  ;;  %3022 = vmatpush.msk.msrb.mxu3 %vm1981_vm5, %v5379_v29  ;;  %vm1975_vm8 = vcmp.eq.s32.totalorder %v4122_v18, %v4213_v4  ;;  %v2997_v20 = vsel %vm1977_vm7, 1.0, %v5368_v59  ;;  %vm1973_vm9 = vcmp.eq.s32.totalorder %v4119_v6, %v4213_v4 }
 0x1e2   : > { %v1520_v36 = vadd.f32 %v1519_v51, %v1418_v42  ;;  %v4258_v10 = vsub.f32 %v2999_v41, %v2999_v41  ;;  %2193 = vmatpush.msrb.mxu2 %v4240_v40  ;;  %v5366_v39 = vand.u32 4294901760, %v4240_v40  ;;  %v4268_v13 = vsub.f32 %v2997_v20, %v2997_v20 }
 0x1e3   : > { %v5365_v31 = vand.u32 4294901760, %v4242_v53  ;;  %v1318_v28 = vadd.f32 %v1317_v57, %v3918_v7  ;;  %3007 = vmatpush.msk.msrb.mxu0 %vm1979_vm6, %v5379_v29  ;;  %3023 = vmatpush.msk.msrb.mxu3 %vm1979_vm6, %v5379_v29  ;;  %v2995_v54 = vsel %vm1975_vm8, 1.0, %v5368_v59  ;;  %v2993_v38 = vsel %vm1973_vm9, 1.0, %v5368_v59 }
 0x1e4   : > { %v1602_v32 = vadd.f32 %v1601_v30, %v1520_v36  ;;  %v5364_v52 = vand.u32 4294901760, %v4258_v10  ;;  %2196 = vmatpush.msrb.mxu2 %v4242_v53  ;;  %v2093_v7 = vsub.f32 %v4240_v40, %v5366_v39  ;;  %v4294_v5 = vsub.f32 %v2995_v54, %v2995_v54 }
 0x1e5   : > { %v2099_v56 = vsub.f32 %v4242_v53, %v5365_v31  ;;  %3008 = vmatpush.msk.msrb.mxu0 %vm1977_vm7, %v5379_v29  ;;  %3024 = vmatpush.msk.msrb.mxu3 %vm1977_vm7, %v5379_v29  ;;  %vm1971_vm10 = vcmp.eq.s32.totalorder %v4100_v35, %v4213_v4  ;;  %v5363_v37 = vand.u32 4294901760, %v4268_v13  ;;  %v4320_v22 = vsub.f32 %v2993_v38, %v2993_v38 }
 0x1e6   : > { %v1605_v24 = vpop.f32.mrf.mxu3  ;;  %v4309_v19 = vsub.f32 %v3903_v50, %v1602_v32  ;;  %v2105_v1 = vsub.f32 %v4258_v10, %v5364_v52  ;;  %2199 = vmatpush.msrb.mxu2 %v4258_v10  ;;  %v2094_v34 = vand.u32 4294901760, %v2093_v7  ;;  %vm1969_vm11 = vcmp.eq.s32.totalorder %v4097_v55, %v4213_v4 }
 0x1e7   : > { %v4311_v21 = vpop.f32.mrf.mxu0  ;;  %v1423_v43 = vpop.f32.mrf.mxu1  ;;  %3009 = vmatpush.msk.msrb.mxu0 %vm1975_vm8, %v5379_v29  ;;  %3025 = vmatpush.msk.msrb.mxu3 %vm1975_vm8, %v5379_v29  ;;  %v2100_v57 = vand.u32 4294901760, %v2099_v56  ;;  %v2111_v44 = vsub.f32 %v4268_v13, %v5363_v37  ;;  %v2991_v8 = vsel %vm1971_vm10, 1.0, %v5368_v59  ;;  %vm1967_vm12 = vcmp.eq.s32.totalorder %v4094_v2, %v4213_v4 }
 0x1e8   : > { %v1424_v25 = vadd.f32 %v1423_v43, %v1318_v28  ;;  %v1523_v50 = vpop.f32.mrf.mxu2  ;;  %2095 = vmatpush.msrb.mxu1 %v2094_v34  ;;  %2202 = vmatpush.msrb.mxu2 %v4268_v13  ;;  %v5362_v42 = vand.u32 4294901760, %v4294_v5  ;;  %v2106_v3 = vand.u32 4294901760, %v2105_v1  ;;  %v4353_v41 = vsub.f32 %v2991_v8, %v2991_v8 }
 0x1e9   : > { %3010 = vmatpush.msk.msrb.mxu0 %vm1973_vm9, %v5379_v29  ;;  %3026 = vmatpush.msk.msrb.mxu3 %vm1973_vm9, %v5379_v29  ;;  %v2989_v36 = vsel %vm1969_vm11, 1.0, %v5368_v59  ;;  %vm1965_vm13 = vcmp.eq.s32.totalorder %v4091_v11, %v4213_v4  ;;  %v5360_v54 = vand.u32 4294901760, %v4320_v22  ;;  %v2987_v7 = vsel %vm1967_vm12, 1.0, %v5368_v59 }
 0x1ea   : > { %v1524_v51 = vadd.f32 %v1523_v50, %v1424_v25  ;;  %2101 = vmatpush.msrb.mxu1 %v2100_v57  ;;  %2205 = vmatpush.msrb.mxu2 %v4294_v5  ;;  %v2117_v28 = vsub.f32 %v4294_v5, %v5362_v42  ;;  %v4365_v32 = vsub.f32 %v2989_v36, %v2989_v36  ;;  %v5359_v56 = vand.u32 4294901760, %v4353_v41 }
 0x1eb   : > { %3011 = vmatpush.msk.msrb.mxu0 %vm1971_vm10, %v5379_v29  ;;  %3027 = vmatpush.msk.msrb.mxu3 %vm1971_vm10, %v5379_v29  ;;  %vm1963_vm14 = vcmp.eq.s32.totalorder %v4056_v16, %v4213_v4  ;;  %v2985_v38 = vsel %vm1965_vm13, 1.0, %v5368_v59  ;;  %v2123_v1 = vsub.f32 %v4320_v22, %v5360_v54  ;;  %v4394_v34 = vsub.f32 %v2987_v7, %v2987_v7 }
 0x1ec   : > { %v1606_v20 = vadd.f32 %v1605_v24, %v1524_v51  ;;  %2107 = vmatpush.msrb.mxu1 %v2106_v3  ;;  %2208 = vmatpush.msrb.mxu2 %v4320_v22  ;;  %v2112_v24 = vand.u32 4294901760, %v2111_v44  ;;  %v4410_v57 = vsub.f32 %v2985_v38, %v2985_v38  ;;  %vm1961_vm15 = vcmp.eq.s32.totalorder %v4053_v17, %v4213_v4 }
 0x1ed   : > { %3012 = vmatpush.msk.msrb.mxu0 %vm1969_vm11, %v5379_v29  ;;  %3028 = vmatpush.msk.msrb.mxu3 %vm1969_vm11, %v5379_v29  ;;  %v5357_v44 = vand.u32 4294901760, %v4365_v32  ;;  %v2118_v8 = vand.u32 4294901760, %v2117_v28  ;;  %v2129_v3 = vsub.f32 %v4353_v41, %v5359_v56  ;;  %v2983_v28 = vsel %vm1963_vm14, 1.0, %v5368_v59 }
 0x1ee   : > { %v4389_v43 = vsub.f32 %v3916_v60, %v1606_v20  ;;  %v4396_v25 = vpop.f32.mrf.mxu3  ;;  %2113 = vmatpush.msrb.mxu1 %v2112_v24  ;;  %2211 = vmatpush.msrb.mxu2 %v4353_v41  ;;  %v2124_v20 = vand.u32 4294901760, %v2123_v1  ;;  %vm1959_vm0 = vcmp.eq.s32.totalorder %v4050_v61, %v4213_v4  ;;  %v4441_v38 = vsub.f32 %v2983_v28, %v2983_v28 }
 0x1ef   : > { %v4406_v60 = vpop.f32.mrf.mxu0  ;;  %v4408_v50 = vpop.f32.mrf.mxu1  ;;  %3013 = vmatpush.msk.msrb.mxu0 %vm1967_vm12, %v5379_v29  ;;  %3029 = vmatpush.msk.msrb.mxu3 %vm1967_vm12, %v5379_v29  ;;  %v2135_v7 = vsub.f32 %v4365_v32, %v5357_v44  ;;  %v5358_v24 = vand.u32 4294901760, %v4394_v34  ;;  %v2981_v1 = vsel %vm1961_vm15, 1.0, %v5368_v59  ;;  %vm1957_vm1 = vcmp.eq.s32.totalorder %v4047_v14, %v4213_v4 }
 0x1f0   : > { %v4421_v36 = vpop.f32.mrf.mxu2  ;;  %2119 = vmatpush.msrb.mxu1 %v2118_v8  ;;  %2214 = vmatpush.msrb.mxu2 %v4365_v32  ;;  %v4456_v8 = vsub.f32 %v2981_v1, %v2981_v1  ;;  %v5361_v28 = vand.u32 4294901760, %v4410_v57  ;;  %v2130_v30 = vand.u32 4294901760, %v2129_v3  ;;  %v2979_v51 = vsel %vm1959_vm0, 1.0, %v5368_v59 }
 0x1f1   : > { %3014 = vmatpush.msk.msrb.mxu0 %vm1965_vm13, %v5379_v29  ;;  %3030 = vmatpush.msk.msrb.mxu3 %vm1965_vm13, %v5379_v29  ;;  %v2141_v44 = vsub.f32 %v4394_v34, %v5358_v24  ;;  %vm1955_vm2 = vcmp.eq.s32.totalorder %v4044_v23, %v4213_v4  ;;  %v4479_v3 = vsub.f32 %v2979_v51, %v2979_v51  ;;  %v2977_v1 = vsel %vm1957_vm1, 1.0, %v5368_v59 }
 0x1f2   : > { %2125 = vmatpush.msrb.mxu1 %v2124_v20  ;;  %2217 = vmatpush.msrb.mxu2 %v4394_v34  ;;  %v5367_v20 = vand.u32 4294901760, %v4441_v38  ;;  %v2136_v24 = vand.u32 4294901760, %v2135_v7  ;;  %v2147_v56 = vsub.f32 %v4410_v57, %v5361_v28  ;;  %v4490_v54 = vsub.f32 %v2977_v1, %v2977_v1 }
 0x1f3   : > { %3015 = vmatpush.msk.msrb.mxu0 %vm1963_vm14, %v5379_v29  ;;  %3031 = vmatpush.msk.msrb.mxu3 %vm1963_vm14, %v5379_v29  ;;  %vm1953_vm3 = vcmp.eq.s32.totalorder %v4038_v45, %v4213_v4  ;;  %v5370_v1 = vand.u32 4294901760, %v4456_v8  ;;  %v2975_v28 = vsel %vm1955_vm2, 1.0, %v5368_v59  ;;  %v2142_v42 = vand.u32 4294901760, %v2141_v44 }
 0x1f4   : > { %2131 = vmatpush.msrb.mxu1 %v2130_v30  ;;  %2220 = vmatpush.msrb.mxu2 %v4410_v57  ;;  %v2153_v37 = vsub.f32 %v4441_v38, %v5367_v20  ;;  %v1235_v39 = vadd.f32 %v3946_v49, %v3948_v47  ;;  %v4524_v44 = vsub.f32 %v2975_v28, %v2975_v28  ;;  %v2148_v49 = vand.u32 4294901760, %v2147_v56 }
 0x1f5   : > { %3016 = vmatpush.msk.msrb.mxu0 %vm1961_vm15, %v5379_v29  ;;  %3032 = vmatpush.msk.msrb.mxu3 %vm1961_vm15, %v5379_v29  ;;  %v2159_v47 = vsub.f32 %v4456_v8, %v5370_v1  ;;  %v5371_v31 = vand.u32 4294901760, %v4490_v54  ;;  %v5440_v28 = vand.u32 4294901760, %v4479_v3  ;;  %v5445_v12 = vand.u32 4294901760, %v4240_v40 }
 0x1f6   : > { %v4494_v51 = vpop.f32.mrf.mxu3  ;;  %2137 = vmatpush.msrb.mxu1 %v2136_v24  ;;  %2223 = vmatpush.msrb.mxu2 %v4441_v38  ;;  %v2973_v24 = vsel %vm1953_vm3, 1.0, %v5368_v59  ;;  %v2154_v56 = vand.u32 4294901760, %v2153_v37  ;;  %v5382_v59 = vand.u32 4294901760, %v4524_v44 }
 0x1f7   : > { %v1332_v30 = vpop.f32.mrf.mxu0  ;;  %v1435_v7 = vpop.f32.mrf.mxu1  ;;  %3017 = vmatpush.msk.msrb.mxu0 %vm1959_vm0, %v5379_v29  ;;  %3033 = vmatpush.msk.msrb.mxu3 %vm1959_vm0, %v5379_v29  ;;  %v4534_v20 = vsub.f32 %v2973_v24, %v2973_v24  ;;  %v2165_v24 = vsub.f32 %v4479_v3, %v5440_v28  ;;  %v2160_v37 = vand.u32 4294901760, %v2159_v47  ;;  %v5441_v47 = vld [vmem:[#allocation21_spill] sm:$0xff] }
 0x1f8   : > { %v1531_v52 = vpop.f32.mrf.mxu2  ;;  %2143 = vmatpush.msrb.mxu1 %v2142_v42  ;;  %2226 = vmatpush.msrb.mxu2 %v4456_v8  ;;  %v1328_v42 = vadd.f32 %v4406_v60, %v1235_v39  ;;  %v2171_v60 = vsub.f32 %v4490_v54, %v5371_v31  ;;  %v1333_v9 = vadd.f32 %v1332_v30, %v1239_v27 }
 0x1f9   : > { %3018 = vmatpush.msk.msrb.mxu0 %vm1957_vm1, %v5379_v29  ;;  %3034 = vmatpush.msk.msrb.mxu3 %vm1957_vm1, %v5379_v29  ;;  %v2166_v31 = vand.u32 4294901760, %v2165_v24  ;;  %v5446_v24 = vand.u32 4294901760, %v4534_v20 }
 0x1fa   : > { %2149 = vmatpush.msrb.mxu1 %v2148_v49  ;;  %2229 = vmatpush.msrb.mxu2 %v4479_v3  ;;  %v1436_v39 = vadd.f32 %v1435_v7, %v1328_v42  ;;  %v2177_v49 = vsub.f32 %v4524_v44, %v5382_v59 }
 0x1fb   : > { %3019 = vmatpush.msk.msrb.mxu0 %vm1955_vm2, %v5379_v29  ;;  %3035 = vmatpush.msk.msrb.mxu3 %vm1955_vm2, %v5379_v29 }
 0x1fc   : > { %2155 = vmatpush.msrb.mxu1 %v2154_v56  ;;  %2232 = vmatpush.msrb.mxu2 %v4490_v54  ;;  %v5442_v56 = vld [vmem:[#allocation20_spill] sm:$0xff]  ;;  %v1532_v33 = vadd.f32 %v1531_v52, %v1436_v39  ;;  %v2178_v46 = vand.u32 4294901760, %v2177_v49 }
 0x1fd   : > { %3020 = vmatpush.msk.msrb.mxu0 %vm1953_vm3, %v5379_v29  ;;  %3036 = vmatpush.msk.msrb.mxu3 %vm1953_vm3, %v5379_v29  ;;  %v1231_v1 = vadd.f32 %v5442_v56, %v5441_v47  ;;  %v2183_v47 = vsub.f32 %v4534_v20, %v5446_v24  ;;  %v5447_v56 = vand.u32 4294901760, %v4242_v53 }
 0x1fe   : > { %v1617_v28 = vpop.f32.mrf.mxu3  ;;  %2161 = vmatpush.msrb.mxu1 %v2160_v37  ;;  %2235 = vmatpush.msrb.mxu2 %v4524_v44  ;;  %v2172_v37 = vand.u32 4294901760, %v2171_v60  ;;  %v1614_v40 = vadd.f32 %v4494_v51, %v1532_v33  ;;  %v5450_v60 = vand.u32 4294901760, %v4268_v13  ;;  %v5452_v33 = vmov 1.0   ;;  %v5453_v51 = vld [vmem:[#allocation22_spill] sm:$0xff] }
 0x1ff   : > { %v1337_v7 = vpop.f32.mrf.mxu0  ;;  %v1441_v42 = vpop.f32.mrf.mxu1  ;;  %2287 = vmatpush.msra.mxu0 %v5445_v12  ;;  %v1323_v29 = vadd.f32 %v4311_v21, %v1231_v1  ;;  %v5448_v12 = vand.u32 4294901760, %v4258_v10  ;;  %v2184_v1 = vand.u32 4294901760, %v2183_v47  ;;  %v5451_v10 = vand.u32 4294901760, %v4294_v5 }
 0x200   : > { %v1535_v0 = vpop.f32.mrf.mxu2  ;;  %2167 = vmatpush.msrb.mxu1 %v2166_v31  ;;  %2238 = vmatpush.msrb.mxu2 %v4534_v20  ;;  %v5449_v31 = vld [vmem:[#allocation8_spill] sm:$0xff]  ;;  %v1442_v21 = vadd.f32 %v1441_v42, %v1333_v9  ;;  %v4604_v30 = vsub.f32 %v5453_v51, %v1614_v40  ;;  %v5460_v40 = vld [vmem:[#allocation19_spill] sm:$0xff] }
 0x201   : > { %2291 = vmatpush.msra.mxu0 %v5447_v56  ;;  %v1430_v59 = vadd.f32 %v4408_v50, %v1323_v29  ;;  %v1338_v52 = vadd.f32 %v1337_v7, %v5449_v31  ;;  %v5454_v7 = vand.u32 4294901760, %v4320_v22  ;;  %v5458_v56 = vld [vmem:[#allocation9_spill] sm:$0xff] }
 0x202   : > { %2173 = vmatpush.msrb.mxu1 %v2172_v37  ;;  %v1536_v13 = vadd.f32 %v1535_v0, %v1442_v21  ;;  %v5456_v0 = vmin.f32 %v4216_v58, %v4389_v43  ;;  %v5457_v37 = vld [vmem:[#allocation10_spill] sm:$0xff]  ;;  %v5461_v21 = vand.u32 4294901760, %v4394_v34  ;;  %v5464_v34 = vmin.f32 %v4208_v26, %v4309_v19 }
 0x203   : > { %2295 = vmatpush.msra.mxu0 %v5448_v12  ;;  %v1528_v27 = vadd.f32 %v4421_v36, %v1430_v59  ;;  %v5455_v36 = vand.u32 4294901760, %v4353_v41  ;;  %v5459_v41 = vand.u32 4294901760, %v4365_v32  ;;  %v5462_v32 = vld [vmem:[#allocation7_spill] sm:$0xff]  ;;  %v5468_v26 = vand.u32 4294901760, %v4456_v8 }
 0x204   : > { %2179 = vmatpush.msrb.mxu1 %v2178_v46  ;;  %v1780_v22 = vmin.f32 %v5456_v0, %v4604_v30  ;;  %v1618_v42 = vadd.f32 %v1617_v28, %v1536_v13  ;;  %v5470_v0 = vand.u32 4294901760, %v4490_v54  ;;  %v5474_v54 = vand.u32 4294901760, %v4534_v20 }
 0x205   : > { %2299 = vmatpush.msra.mxu0 %v5450_v60  ;;  %v1610_v59 = vadd.f32 %v4396_v25, %v1528_v27  ;;  %v5463_v60 = vand.u32 4294901760, %v4410_v57  ;;  %v5465_v27 = vand.u32 4294901760, %v4441_v38 }
 0x206   : > { %v1621_v39 = vpop.f32.mrf.mxu3  ;;  %2185 = vmatpush.msrb.mxu1 %v2184_v1  ;;  %v4644_v1 = vsub.f32 %v5462_v32, %v1618_v42  ;;  %v5471_v42 = vand.u32 4294901760, %v4524_v44 }
 0x207   : > { %v1342_v53 = vpop.f32.mrf.mxu0  ;;  %v1447_v24 = vpop.f32.mrf.mxu1  ;;  %2303 = vmatpush.msra.mxu0 %v5451_v10  ;;  %v4634_v58 = vsub.f32 %v5460_v40, %v1610_v59  ;;  %v5467_v10 = vld [vmem:[#allocation11_spill] sm:$0xff] }
 0x208   : > { %v1448_v29 = vadd.f32 %v1447_v24, %v1338_v52  ;;  %v1539_v50 = vpop.f32.mrf.mxu2  ;;  %3037 = vmatpush.msk.msra.mxu1 %vm1983_vm4, %v5452_v33  ;;  %v1343_v47 = vadd.f32 %v1342_v53, %v5457_v37 }
 0x209   : > { %2307 = vmatpush.msra.mxu0 %v5454_v7  ;;  %v1779_v53 = vmin.f32 %v5464_v34, %v4634_v58 }
 0x20a   : > { %v1540_v49 = vadd.f32 %v1539_v50, %v1448_v29  ;;  %3038 = vmatpush.msk.msra.mxu1 %vm1981_vm5, %v5452_v33  ;;  %v5466_v29 = vld [vmem:[#allocation12_spill] sm:$0xff] }
 0x20b   : > { %2311 = vmatpush.msra.mxu0 %v5455_v36  ;;  %v1781_v57 = vmin.f32 %v1779_v53, %v4644_v1 }
 0x20c   : > { %v1622_v5 = vadd.f32 %v1621_v39, %v1540_v49  ;;  %3039 = vmatpush.msk.msra.mxu1 %vm1979_vm6, %v5452_v33 }
 0x20d   : > { %2315 = vmatpush.msra.mxu0 %v5459_v41 }
 0x20e   : > { %v4625_v9 = vsub.f32 %v5458_v56, %v1622_v5  ;;  %v1625_v25 = vpop.f32.mrf.mxu3  ;;  %3040 = vmatpush.msk.msra.mxu1 %vm1977_vm7, %v5452_v33  ;;  %v5469_v5 = vand.u32 4294901760, %v4479_v3  ;;  %v5472_v3 = vld [vmem:[#allocation14_spill] sm:$0xff] }
 0x20f   : > { %v1347_v46 = vpop.f32.mrf.mxu0  ;;  %v1453_v12 = vpop.f32.mrf.mxu1  ;;  %2319 = vmatpush.msra.mxu0 %v5461_v21  ;;  %v5476_v21 = vld [vmem:[#allocation15_spill] sm:$0xff] }
 0x210   : > { %v1782_v28 = vmin.f32 %v1780_v22, %v4625_v9  ;;  %v1454_v31 = vadd.f32 %v1453_v12, %v1343_v47  ;;  %v1543_v52 = vpop.f32.mrf.mxu2  ;;  %3041 = vmatpush.msk.msra.mxu1 %vm1975_vm8, %v5452_v33  ;;  %v1348_v50 = vadd.f32 %v1347_v46, %v5466_v29  ;;  %v5473_v47 = vld [vmem:[#allocation13_spill] sm:$0xff] }
 0x211   : > { %2323 = vmatpush.msra.mxu0 %v5463_v60  ;;  %v5477_v29 = vld [vmem:[#allocation17_spill] sm:$0xff] }
 0x212   : > { %v1544_v39 = vadd.f32 %v1543_v52, %v1454_v31  ;;  %3042 = vmatpush.msk.msra.mxu1 %vm1973_vm9, %v5452_v33 }
 0x213   : > { %2327 = vmatpush.msra.mxu0 %v5465_v27 }
 0x214   : > { %v1626_v24 = vadd.f32 %v1625_v25, %v1544_v39  ;;  %3043 = vmatpush.msk.msra.mxu1 %vm1971_vm10, %v5452_v33 }
 0x215   : > { %2331 = vmatpush.msra.mxu0 %v5468_v26 }
 0x216   : > { %v4665_v51 = vsub.f32 %v5467_v10, %v1626_v24  ;;  %v1629_v13 = vpop.f32.mrf.mxu3  ;;  %3044 = vmatpush.msk.msra.mxu1 %vm1969_vm11, %v5452_v33 }
 0x217   : > { %v1459_v38 = vpop.f32.mrf.mxu1  ;;  %2335 = vmatpush.msra.mxu0 %v5469_v5  ;;  %v1352_v8 = vpop.f32.mrf.mxu0 }
 0x218   : > { %v1783_v49 = vmin.f32 %v1781_v57, %v4665_v51  ;;  %v1460_v7 = vadd.f32 %v1459_v38, %v1348_v50  ;;  %v1547_v59 = vpop.f32.mrf.mxu2  ;;  %3045 = vmatpush.msk.msra.mxu1 %vm1967_vm12, %v5452_v33  ;;  %v1353_v37 = vadd.f32 %v1352_v8, %v5472_v3  ;;  %v5483_v3 = vld [vmem:[#allocation28_spill] sm:$0xff] }
 0x219   : > { %2339 = vmatpush.msra.mxu0 %v5470_v0  ;;  %v5480_v0 = vld [vmem:[#allocation24_spill] sm:$0xff] }
 0x21a   : > { %v1548_v36 = vadd.f32 %v1547_v59, %v1460_v7  ;;  %3046 = vmatpush.msk.msra.mxu1 %vm1965_vm13, %v5452_v33 }
 0x21b   : > { %2343 = vmatpush.msra.mxu0 %v5471_v42  ;;  %v5482_v42 = vld [vmem:[#allocation27_spill] sm:$0xff] }
 0x21c   : > { %v1630_v22 = vadd.f32 %v1629_v13, %v1548_v36  ;;  %3047 = vmatpush.msk.msra.mxu1 %vm1963_vm14, %v5452_v33  ;;  %v5479_v36 = vld [vmem:[#allocation25_spill] sm:$0xff] }
 0x21d   : > { %2347 = vmatpush.msra.mxu0 %v5474_v54 }
 0x21e   : > { %v4694_v56 = vsub.f32 %v5473_v47, %v1630_v22  ;;  %3048 = vmatpush.msk.msra.mxu1 %vm1961_vm15, %v5452_v33  ;;  %v1633_v25 = vpop.f32.mrf.mxu3  ;;  %v5481_v22 = vld [vmem:[#allocation26_spill] sm:$0xff] }
 0x21f   : > { %v1465_v44 = vpop.f32.mrf.mxu1  ;;  %v1357_v20 = vpop.f32.mrf.mxu0 }
 0x220   : > { %v1784_v41 = vmin.f32 %v1782_v28, %v4694_v56  ;;  %v1466_v46 = vadd.f32 %v1465_v44, %v1353_v37  ;;  %v1551_v12 = vpop.f32.mrf.mxu2  ;;  %3049 = vmatpush.msk.msra.mxu1 %vm1959_vm0, %v5452_v33  ;;  %v5475_v28 = vld [vmem:[#allocation16_spill] sm:$0xff] }
 0x221   : > { %v1358_v52 = vadd.f32 %v1357_v20, %v5475_v28 }
 0x222   : > { %v1552_v40 = vadd.f32 %v1551_v12, %v1466_v46  ;;  %3050 = vmatpush.msk.msra.mxu1 %vm1957_vm1, %v5452_v33 }
 0x224   : > { %v1634_v31 = vadd.f32 %v1633_v25, %v1552_v40  ;;  %3051 = vmatpush.msk.msra.mxu1 %vm1955_vm2, %v5452_v33  ;;  %v358_v25 = vld [vmem:[%s5328_s2] sm:$0xf] }
 0x226   : > { %v4717_v32 = vsub.f32 %v5476_v21, %v1634_v31  ;;  %3052 = vmatpush.msk.msra.mxu1 %vm1953_vm3, %v5452_v33  ;;  %v1637_v24 = vpop.f32.mrf.mxu3 }
 0x227   : > { %v1471_v39 = vpop.f32.mrf.mxu1 }
 0x228   : > { %v1785_v60 = vmin.f32 %v1783_v49, %v4717_v32  ;;  %v1472_v34 = vadd.f32 %v1471_v39, %v1358_v52  ;;  %v1555_v53 = vpop.f32.mrf.mxu2  ;;  %v5478_v49 = vld [vmem:[#allocation18_spill] sm:$0xff] }
 0x22a   : > { %v1556_v27 = vadd.f32 %v1555_v53, %v1472_v34 }
 0x22c   : > { %v1638_v57 = vadd.f32 %v1637_v24, %v1556_v27 }
 0x22e   : > { %v4725_v50 = vsub.f32 %v5477_v29, %v1638_v57 }
 0x230   : > { %v1786_v10 = vmin.f32 %v1784_v41, %v4725_v50  ;;  %v4765_v41 = vand.u32 4294901760, %v358_v25 }
 0x232   : > { %v1787_v13 = vmin.f32 %v1785_v60, %v1786_v10  ;;  %2187 = vmatmul.f32.vlgmr.msrb.gmra.mxu1 %v4765_v41  ;;  %v4779_v31 = vsub.f32 %v358_v25, %v4765_v41 }
 0x234   : > { %v1788_v26 = vrot.slane %v1787_v13, 4  ;;  %2241 = vmatmul.f32.vlgmr.msrb.gmra.mxu2 %v4779_v31 }
 0x236   : > { %v1789_v38 = vmin.f32 %v1787_v13, %v1788_v26 }
 0x238   : > { %v1790_v7 = vrot.slane %v1789_v38, 2 }
 0x23a   : > { %v1791_v59 = vmin.f32 %v1789_v38, %v1790_v7  ;;  %2386 = vmatmul.f32.vlgmr.msra.gmra.mxu1 %v4765_v41 }
 0x23c   : > { %v1792_v5 = vrot.slane %v1791_v59, 1 }
 0x23e   : > { %v4728_v8 = vmin.f32 %v1791_v59, %v1792_v5 }
 0x240   : > { %vm1812_vm4 = vcmp.le.f32.partialorder %v5478_v49, %v4728_v8  ;;  %vm1814_vm5 = vcmp.le.f32.partialorder %v5479_v36, %v4728_v8  ;;  %vm1816_vm6 = vcmp.le.f32.partialorder %v5480_v0, %v4728_v8  ;;  %vm1818_vm7 = vcmp.le.f32.partialorder %v5481_v22, %v4728_v8 }
 0x241   : > { %vm1820_vm8 = vcmp.le.f32.partialorder %v5482_v42, %v4728_v8  ;;  %vm1822_vm9 = vcmp.le.f32.partialorder %v5483_v3, %v4728_v8  ;;  %vm1824_vm10 = vcmp.le.f32.partialorder %v4309_v19, %v4728_v8  ;;  %vm1826_vm11 = vcmp.le.f32.partialorder %v4389_v43, %v4728_v8 }
 0x242   : > { %vm1834_vm12 = vcmp.le.f32.partialorder %v4625_v9, %v4728_v8  ;;  %vm1836_vm13 = vcmp.le.f32.partialorder %v4665_v51, %v4728_v8  ;;  %vm1838_vm14 = vcmp.le.f32.partialorder %v4694_v56, %v4728_v8  ;;  %vm1840_vm15 = vcmp.le.f32.partialorder %v4717_v32, %v4728_v8 }
 0x243   : > { %vm1842_vm0 = vcmp.le.f32.partialorder %v4725_v50, %v4728_v8  ;;  %v1844_v37 = vsel %vm1812_vm4, %v4038_v45, 128  ;;  %v1846_v47 = vsel %vm1814_vm5, %v4044_v23, 128  ;;  %v1848_v54 = vsel %vm1816_vm6, %v4047_v14, 128 }
 0x244   : > { %v1850_v44 = vsel %vm1818_vm7, %v4050_v61, 128  ;;  %vm1828_vm1 = vcmp.le.f32.partialorder %v4634_v58, %v4728_v8  ;;  %vm1914_vm2 = vcmp.lt.s32.totalorder %v1844_v37, %v1848_v54  ;;  %v1852_v46 = vsel %vm1820_vm8, %v4053_v17, 128 }
 0x245   : > { %vm1916_vm3 = vcmp.lt.s32.totalorder %v1846_v47, %v1850_v44  ;;  %v1854_v12 = vsel %vm1822_vm9, %v4056_v16, 128  ;;  %v1915_v40 = vsel %vm1914_vm2, %v1844_v37, %v1848_v54  ;;  %vm1830_vm4 = vcmp.le.f32.partialorder %v4604_v30, %v4728_v8 }
 0x246   : > { %v1917_v20 = vsel %vm1916_vm3, %v1846_v47, %v1850_v44  ;;  %vm1918_vm5 = vcmp.lt.s32.totalorder %v1915_v40, %v1852_v46  ;;  %v1856_v28 = vsel %vm1824_vm10, %v4091_v11, 128  ;;  %v1858_v52 = vsel %vm1826_vm11, %v4094_v2, 128 }
 0x247   : > { %vm1920_vm6 = vcmp.lt.s32.totalorder %v1917_v20, %v1854_v12  ;;  %v1919_v21 = vsel %vm1918_vm5, %v1915_v40, %v1852_v46  ;;  %vm1832_vm7 = vcmp.le.f32.partialorder %v4644_v1, %v4728_v8  ;;  %v4792_v30 = vand.u32 4294901760, %v4779_v31 }
 0x248   : > { %v1921_v39 = vsel %vm1920_vm6, %v1917_v20, %v1854_v12  ;;  %vm1922_vm8 = vcmp.lt.s32.totalorder %v1919_v21, %v1856_v28  ;;  %v1860_v19 = vsel %vm1828_vm1, %v4097_v55, 128  ;;  %v1862_v43 = vsel %vm1830_vm4, %v4100_v35, 128 }
 0x249   : > { %vm1924_vm9 = vcmp.lt.s32.totalorder %v1921_v39, %v1858_v52  ;;  %v1923_v60 = vsel %vm1922_vm8, %v1919_v21, %v1856_v28  ;;  %v2084_v1 = vsub.f32 %v4779_v31, %v4792_v30  ;;  %2280 = vmatmul.f32.vlgmr.msrb.gmra.mxu3 %v4792_v30  ;;  %v1864_v53 = vsel %vm1832_vm7, %v4119_v6, 128 }
 0x24a   : > { %v1925_v34 = vsel %vm1924_vm9, %v1921_v39, %v1858_v52  ;;  %vm1926_vm10 = vcmp.lt.s32.totalorder %v1923_v60, %v1860_v19  ;;  %v1866_v24 = vsel %vm1834_vm12, %v4122_v18, 128  ;;  %v1868_v29 = vsel %vm1836_vm13, %v4125_v62, 128 }
 0x24b   : > { %vm1928_vm11 = vcmp.lt.s32.totalorder %v1925_v34, %v1862_v43  ;;  %v1927_v58 = vsel %vm1926_vm10, %v1923_v60, %v1860_v19  ;;  %v4808_v57 = vand.u32 4294901760, %v2084_v1  ;;  %v1870_v10 = vsel %vm1838_vm14, %v4128_v15, 128 }
 0x24c   : > { %v1929_v27 = vsel %vm1928_vm11, %v1925_v34, %v1862_v43  ;;  %vm1930_vm1 = vcmp.lt.s32.totalorder %v1927_v58, %v1864_v53  ;;  %v1872_v9 = vsel %vm1840_vm15, %v4131_v48, 128  ;;  %v1874_v51 = vsel %vm1842_vm0, %v4134_v63, 128 }
 0x24d   : > { %vm1932_vm2 = vcmp.lt.s32.totalorder %v1929_v27, %v1866_v24  ;;  %v1931_v13 = vsel %vm1930_vm1, %v1927_v58, %v1864_v53  ;;  %2086 = vmatmul.f32.vlgmr.msrb.gmra.mxu0 %v4808_v57  ;;  %v5484_v8 = vmov 0.0  }
 0x24e   : > { %v1933_v26 = vsel %vm1932_vm2, %v1929_v27, %v1866_v24  ;;  %vm1934_vm3 = vcmp.lt.s32.totalorder %v1931_v13, %v1868_v29 }
 0x24f   : > { %vm1936_vm12 = vcmp.lt.s32.totalorder %v1933_v26, %v1870_v10  ;;  %v1935_v56 = vsel %vm1934_vm3, %v1931_v13, %v1868_v29 }
 0x250   : > { %v1937_v38 = vsel %vm1936_vm12, %v1933_v26, %v1870_v10  ;;  %vm1938_vm13 = vcmp.lt.s32.totalorder %v1935_v56, %v1872_v9 }
 0x251   : > { %vm1940_vm14 = vcmp.lt.s32.totalorder %v1937_v38, %v1874_v51  ;;  %v1939_v7 = vsel %vm1938_vm13, %v1935_v56, %v1872_v9 }
 0x252   : > { %v1941_v59 = vsel %vm1940_vm14, %v1937_v38, %v1874_v51 }
 0x253   : > { %vm1942_vm4 = vcmp.lt.s32.totalorder %v1939_v7, %v1941_v59 }
 0x254   : > { %v1943_v5 = vsel %vm1942_vm4, %v1939_v7, %v1941_v59 }
 0x255   : > { %v1944_v49 = vrot.slane %v1943_v5, 4  ;;  %2349 = vmatmul.f32.vlgmr.msra.gmra.mxu0 %v4765_v41 }
 0x257   : > { %vm1945_vm5 = vcmp.lt.s32.totalorder %v1943_v5, %v1944_v49 }
 0x258   : > { %v1946_v36 = vsel %vm1945_vm5, %v1943_v5, %v1944_v49 }
 0x259   : > { %v1947_v32 = vrot.slane %v1946_v36, 2 }
 0x25b   : > { %vm1948_vm15 = vcmp.lt.s32.totalorder %v1946_v36, %v1947_v32 }
 0x25c   : > { %v1949_v0 = vsel %vm1948_vm15, %v1946_v36, %v1947_v32 }
 0x25d   : > { %v1950_v22 = vrot.slane %v1949_v0, 1 }
 0x25f   : > { %vm1951_vm6 = vcmp.lt.s32.totalorder %v1949_v0, %v1950_v22 }
 0x260   : > { %v4829_v50 = vsel %vm1951_vm6, %v1949_v0, %v1950_v22  ;;  %vm2746_vm6 = vcmask 1040384  }
 0x261   : > { %vm1984_vm0 = vcmp.eq.s32.totalorder %v4134_v63, %v4829_v50  ;;  %vm1982_vm7 = vcmp.eq.s32.totalorder %v4131_v48, %v4829_v50  ;;  %vm1980_vm8 = vcmp.eq.s32.totalorder %v4128_v15, %v4829_v50  ;;  %vm1978_vm9 = vcmp.eq.s32.totalorder %v4125_v62, %v4829_v50 }
 0x262   : > { %3053 = vmatpush.msk.msra.mxu2 %vm1984_vm0, %v5452_v33  ;;  %3069 = vmatpush.msk.msrb.mxu1 %vm1984_vm0, %v5452_v33  ;;  %v3004_v42 = vsel %vm1984_vm0, 1.0, %v5484_v8  ;;  %v3002_v3 = vsel %vm1982_vm7, 1.0, %v5484_v8  ;;  %v3000_v37 = vsel %vm1980_vm8, 1.0, %v5484_v8  ;;  %vm1976_vm10 = vcmp.eq.s32.totalorder %v4122_v18, %v4829_v50 }
 0x263   : > { %v4861_v47 = vsub.f32 %v3004_v42, %v3004_v42  ;;  %v4863_v54 = vsub.f32 %v3002_v3, %v3002_v3  ;;  %v4865_v44 = vsub.f32 %v3000_v37, %v3000_v37  ;;  %v2998_v25 = vsel %vm1978_vm9, 1.0, %v5484_v8 }
 0x264   : > { %3054 = vmatpush.msk.msra.mxu2 %vm1982_vm7, %v5452_v33  ;;  %3070 = vmatpush.msk.msrb.mxu1 %vm1982_vm7, %v5452_v33  ;;  %v4879_v46 = vsub.f32 %v2998_v25, %v2998_v25  ;;  %vm1974_vm11 = vcmp.eq.s32.totalorder %v4119_v6, %v4829_v50  ;;  %v2996_v12 = vsel %vm1976_vm10, 1.0, %v5484_v8  ;;  %vm1972_vm1 = vcmp.eq.s32.totalorder %v4100_v35, %v4829_v50 }
 0x265   : > { %2534 = vmatpush.msrb.mxu0 %v4861_v47  ;;  %v2433_v40 = vand.u32 4294901760, %v4861_v47  ;;  %v2439_v20 = vand.u32 4294901760, %v4863_v54  ;;  %v4892_v28 = vsub.f32 %v2996_v12, %v2996_v12  ;;  %v2445_v52 = vand.u32 4294901760, %v4865_v44 }
 0x266   : > { %3055 = vmatpush.msk.msra.mxu2 %vm1980_vm8, %v5452_v33  ;;  %3071 = vmatpush.msk.msrb.mxu1 %vm1980_vm8, %v5452_v33  ;;  %v2994_v21 = vsel %vm1974_vm11, 1.0, %v5484_v8  ;;  %vm1970_vm2 = vcmp.eq.s32.totalorder %v4097_v55, %v4829_v50  ;;  %v2451_v39 = vand.u32 4294901760, %v4879_v46  ;;  %v2992_v19 = vsel %vm1972_vm1, 1.0, %v5484_v8 }
 0x267   : > { %2537 = vmatpush.msrb.mxu0 %v4863_v54  ;;  %v2434_v43 = vsub.f32 %v4861_v47, %v2433_v40  ;;  %v2440_v60 = vsub.f32 %v4863_v54, %v2439_v20  ;;  %v4921_v34 = vsub.f32 %v2994_v21, %v2994_v21  ;;  %v4931_v1 = vsub.f32 %v2992_v19, %v2992_v19 }
 0x268   : > { %3056 = vmatpush.msk.msra.mxu2 %vm1978_vm9, %v5452_v33  ;;  %3072 = vmatpush.msk.msrb.mxu1 %vm1978_vm9, %v5452_v33  ;;  %vm5384_vm3 = vcmp.eq.s32.totalorder %v4094_v2, %v4829_v50  ;;  %v2446_v24 = vsub.f32 %v4865_v44, %v2445_v52  ;;  %v2457_v58 = vand.u32 4294901760, %v4892_v28  ;;  %v2990_v27 = vsel %vm1970_vm2, 1.0, %v5484_v8 }
 0x269   : > { %2540 = vmatpush.msrb.mxu0 %v4865_v44  ;;  %v2435_v53 = vand.u32 4294901760, %v2434_v43  ;;  %v2441_v29 = vand.u32 4294901760, %v2440_v60  ;;  %v2452_v10 = vsub.f32 %v4879_v46, %v2451_v39  ;;  %vm5383_vm12 = vcmp.eq.s32.totalorder %v4091_v11, %v4829_v50 }
 0x26a   : > { %3057 = vmatpush.msk.msra.mxu2 %vm1976_vm10, %v5452_v33  ;;  %3073 = vmatpush.msk.msrb.mxu1 %vm1976_vm10, %v5452_v33  ;;  %v4958_v13 = vsub.f32 %v2990_v27, %v2990_v27  ;;  %v2463_v26 = vand.u32 4294901760, %v4921_v34  ;;  %v2988_v9 = vsel %vm5384_vm3, 1.0, %v5484_v8  ;;  %vm1964_vm13 = vcmp.eq.s32.totalorder %v4056_v16, %v4829_v50 }
 0x26b   : > { %2436 = vmatpush.msra.mxu3 %v2435_v53  ;;  %2543 = vmatpush.msrb.mxu0 %v4879_v46  ;;  %v2469_v51 = vand.u32 4294901760, %v4931_v1  ;;  %v2986_v56 = vsel %vm5383_vm12, 1.0, %v5484_v8  ;;  %v2447_v38 = vand.u32 4294901760, %v2446_v24  ;;  %v2458_v7 = vsub.f32 %v4892_v28, %v2457_v58 }
 0x26c   : > { %3058 = vmatpush.msk.msra.mxu2 %vm1974_vm11, %v5452_v33  ;;  %3074 = vmatpush.msk.msrb.mxu1 %vm1974_vm11, %v5452_v33  ;;  %v4984_v59 = vsub.f32 %v2988_v9, %v2988_v9  ;;  %vm1962_vm14 = vcmp.eq.s32.totalorder %v4053_v17, %v4829_v50  ;;  %v2464_v5 = vsub.f32 %v4921_v34, %v2463_v26  ;;  %v2984_v49 = vsel %vm1964_vm13, 1.0, %v5484_v8 }
 0x26d   : > { %2442 = vmatpush.msra.mxu3 %v2441_v29  ;;  %2546 = vmatpush.msrb.mxu0 %v4892_v28  ;;  %v2453_v36 = vand.u32 4294901760, %v2452_v10  ;;  %v5004_v32 = vsub.f32 %v2986_v56, %v2986_v56  ;;  %v2475_v0 = vand.u32 4294901760, %v4958_v13  ;;  %vm1960_vm4 = vcmp.eq.s32.totalorder %v4050_v61, %v4829_v50 }
 0x26e   : > { %3059 = vmatpush.msk.msra.mxu2 %vm1972_vm1, %v5452_v33  ;;  %3075 = vmatpush.msk.msrb.mxu1 %vm1972_vm1, %v5452_v33  ;;  %v2470_v22 = vsub.f32 %v4931_v1, %v2469_v51  ;;  %v2982_v42 = vsel %vm1962_vm14, 1.0, %v5484_v8  ;;  %v2459_v3 = vand.u32 4294901760, %v2458_v7  ;;  %v5026_v37 = vsub.f32 %v2984_v49, %v2984_v49 }
 0x26f   : > { %2448 = vmatpush.msra.mxu3 %v2447_v38  ;;  %2549 = vmatpush.msrb.mxu0 %v4921_v34  ;;  %v2481_v25 = vand.u32 4294901760, %v4984_v59  ;;  %vm1958_vm5 = vcmp.eq.s32.totalorder %v4047_v14, %v4829_v50  ;;  %v2465_v12 = vand.u32 4294901760, %v2464_v5  ;;  %v2980_v21 = vsel %vm1960_vm4, 1.0, %v5484_v8 }
 0x270   : > { %3060 = vmatpush.msk.msra.mxu2 %vm1970_vm2, %v5452_v33  ;;  %3076 = vmatpush.msk.msrb.mxu1 %vm1970_vm2, %v5452_v33  ;;  %v2476_v19 = vsub.f32 %v4958_v13, %v2475_v0  ;;  %v5047_v43 = vsub.f32 %v2982_v42, %v2982_v42  ;;  %v2487_v60 = vand.u32 4294901760, %v5004_v32  ;;  %vm1956_vm15 = vcmp.eq.s32.totalorder %v4044_v23, %v4829_v50 }
 0x271   : > { %2454 = vmatpush.msra.mxu3 %v2453_v36  ;;  %2552 = vmatpush.msrb.mxu0 %v4931_v1  ;;  %v2471_v53 = vand.u32 4294901760, %v2470_v22  ;;  %v2978_v24 = vsel %vm1958_vm5, 1.0, %v5484_v8  ;;  %v2482_v27 = vsub.f32 %v4984_v59, %v2481_v25  ;;  %v5072_v29 = vsub.f32 %v2980_v21, %v2980_v21 }
 0x272   : > { %3061 = vmatpush.msk.msra.mxu2 %vm5384_vm3, %v5452_v33  ;;  %3077 = vmatpush.msk.msrb.mxu1 %vm5384_vm3, %v5452_v33  ;;  %v2493_v10 = vand.u32 4294901760, %v5026_v37  ;;  %v2976_v9 = vsel %vm1956_vm15, 1.0, %v5484_v8  ;;  %v2745_v56 = vrot.slane %v4829_v50, 7  ;;  %v5485_v38 = vlaneseq }
 0x273   : > { %2460 = vmatpush.msra.mxu3 %v2459_v3  ;;  %2555 = vmatpush.msrb.mxu0 %v4958_v13  ;;  %v2477_v5 = vand.u32 4294901760, %v2476_v19  ;;  %v2488_v49 = vsub.f32 %v5004_v32, %v2487_v60  ;;  %v5099_v36 = vsub.f32 %v2978_v24, %v2978_v24  ;;  %v2499_v22 = vand.u32 4294901760, %v5047_v43 }
 0x274   : > { %3062 = vmatpush.msk.msra.mxu2 %vm5383_vm12, %v5452_v33  ;;  %3078 = vmatpush.msk.msrb.mxu1 %vm5383_vm12, %v5452_v33  ;;  %vm1954_vm12 = vcmp.eq.s32.totalorder %v4038_v45, %v4829_v50  ;;  %vm5091_vm3 = vcmp.lt.s32.totalorder %v5485_v38, 256  ;;  %v2747_v3 = vsel %vm2746_vm6, %v4213_v4, %v2745_v56  ;;  %v2494_v21 = vsub.f32 %v5026_v37, %v2493_v10 }
 0x275   : > { %2466 = vmatpush.msra.mxu3 %v2465_v12  ;;  %2558 = vmatpush.msrb.mxu0 %v4984_v59  ;;  %v2974_v42 = vsel %vm1954_vm12, 1.0, %v5484_v8  ;;  %v2483_v12 = vand.u32 4294901760, %v2482_v27  ;;  %v5120_v19 = vsub.f32 %v2976_v9, %v2976_v9  ;;  %2752 = vst.msk [vmem:[%s285_s8] sm:$0x3] %vm5091_vm3, %v2747_v3  ;;  %v2489_v4 = vand.u32 4294901760, %v2488_v49 }
 0x276   : > { %3063 = vmatpush.msk.msra.mxu2 %vm1964_vm13, %v5452_v33  ;;  %3079 = vmatpush.msk.msrb.mxu1 %vm1964_vm13, %v5452_v33  ;;  %v2500_v8 = vsub.f32 %v5047_v43, %v2499_v22  ;;  %v2522_v24 = vsub.f32 %v2974_v42, %v2974_v42  ;;  %v2511_v27 = vand.u32 4294901760, %v5099_v36  ;;  %v2495_v9 = vand.u32 4294901760, %v2494_v21 }
 0x277   : > { %2472 = vmatpush.msra.mxu3 %v2471_v53  ;;  %2561 = vmatpush.msrb.mxu0 %v5004_v32  ;;  %v2505_v53 = vand.u32 4294901760, %v5072_v29  ;;  %v2517_v38 = vand.u32 4294901760, %v5120_v19 }
 0x278   : > { %3064 = vmatpush.msk.msra.mxu2 %vm1962_vm14, %v5452_v33  ;;  %3080 = vmatpush.msk.msrb.mxu1 %vm1962_vm14, %v5452_v33  ;;  %v2512_v49 = vsub.f32 %v5099_v36, %v2511_v27  ;;  %v2523_v42 = vand.u32 4294901760, %v2522_v24 }
 0x279   : > { %2478 = vmatpush.msra.mxu3 %v2477_v5  ;;  %2564 = vmatpush.msrb.mxu0 %v5026_v37  ;;  %v2506_v56 = vsub.f32 %v5072_v29, %v2505_v53  ;;  %v2501_v5 = vand.u32 4294901760, %v2500_v8 }
 0x27a   : > { %3065 = vmatpush.msk.msra.mxu2 %vm1960_vm4, %v5452_v33  ;;  %3081 = vmatpush.msk.msrb.mxu1 %vm1960_vm4, %v5452_v33  ;;  %v2524_v21 = vsub.f32 %v2522_v24, %v2523_v42 }
 0x27b   : > { %2484 = vmatpush.msra.mxu3 %v2483_v12  ;;  %2567 = vmatpush.msrb.mxu0 %v5047_v43  ;;  %v2507_v3 = vand.u32 4294901760, %v2506_v56  ;;  %v2518_v12 = vsub.f32 %v5120_v19, %v2517_v38 }
 0x27c   : > { %3066 = vmatpush.msk.msra.mxu2 %vm1958_vm5, %v5452_v33  ;;  %3082 = vmatpush.msk.msrb.mxu1 %vm1958_vm5, %v5452_v33  ;;  %v2525_v47 = vand.u32 4294901760, %v2524_v21 }
 0x27d   : > { %2490 = vmatpush.msra.mxu3 %v2489_v4  ;;  %2570 = vmatpush.msrb.mxu0 %v5072_v29  ;;  %v2519_v4 = vand.u32 4294901760, %v2518_v12 }
 0x27e   : > { %3067 = vmatpush.msk.msra.mxu2 %vm1956_vm15, %v5452_v33  ;;  %3083 = vmatpush.msk.msrb.mxu1 %vm1956_vm15, %v5452_v33 }
 0x27f   : > { %2496 = vmatpush.msra.mxu3 %v2495_v9  ;;  %2573 = vmatpush.msrb.mxu0 %v5099_v36  ;;  %v2513_v36 = vand.u32 4294901760, %v2512_v49 }
 0x280   : > { %3068 = vmatpush.msk.msra.mxu2 %vm1954_vm12, %v5452_v33  ;;  %3084 = vmatpush.msk.msrb.mxu1 %vm1954_vm12, %v5452_v33 }
 0x281   : > { %2502 = vmatpush.msra.mxu3 %v2501_v5  ;;  %2576 = vmatpush.msrb.mxu0 %v5120_v19 }
 0x282   : > { %2628 = vmatpush.msrb.mxu2 %v2433_v40  ;;  %2621 = vmatmul.f32.vlgmr.msrb.gmra.mxu1 %v4792_v30 }
 0x283   : > { %2508 = vmatpush.msra.mxu3 %v2507_v3  ;;  %2579 = vmatpush.msrb.mxu0 %v2522_v24 }
 0x284   : > { %2632 = vmatpush.msrb.mxu2 %v2439_v20  ;;  %2582 = vmatmul.f32.vlgmr.msrb.gmra.mxu0 %v4779_v31 }
 0x285   : > { %2514 = vmatpush.msra.mxu3 %v2513_v36  ;;  %2427 = vmatmul.f32.vlgmr.msra.gmra.mxu2 %v4808_v57 }
 0x286   : > { %2636 = vmatpush.msrb.mxu2 %v2445_v52 }
 0x287   : > { %2520 = vmatpush.msra.mxu3 %v2519_v4 }
 0x288   : > { %2640 = vmatpush.msrb.mxu2 %v2451_v39 }
 0x289   : > { %2526 = vmatpush.msra.mxu3 %v2525_v47 }
 0x28a   : > { %2644 = vmatpush.msrb.mxu2 %v2457_v58  ;;  %2528 = vmatmul.f32.vlgmr.msra.gmra.mxu3 %v4765_v41 }
 0x28b   : > { %3085 = vmatpush.msk.msrb.mxu3 %vm1984_vm0, %v5452_v33  ;;  %vm5488_vm0 = vcmp.eq.s32.totalorder %v4094_v2, %v4829_v50 }
 0x28c   : > { %2648 = vmatpush.msrb.mxu2 %v2463_v26 }
 0x28d   : > { %3086 = vmatpush.msk.msrb.mxu3 %vm1982_vm7, %v5452_v33  ;;  %vm5489_vm7 = vcmp.eq.s32.totalorder %v4091_v11, %v4829_v50 }
 0x28e   : > { %2652 = vmatpush.msrb.mxu2 %v2469_v51 }
 0x28f   : > { %3087 = vmatpush.msk.msrb.mxu3 %vm1980_vm8, %v5452_v33 }
 0x290   : > { %2656 = vmatpush.msrb.mxu2 %v2475_v0 }
 0x291   : > { %3088 = vmatpush.msk.msrb.mxu3 %vm1978_vm9, %v5452_v33 }
 0x292   : > { %2660 = vmatpush.msrb.mxu2 %v2481_v25 }
 0x293   : > { %3089 = vmatpush.msk.msrb.mxu3 %vm1976_vm10, %v5452_v33 }
 0x294   : > { %2664 = vmatpush.msrb.mxu2 %v2487_v60 }
 0x295   : > { %3090 = vmatpush.msk.msrb.mxu3 %vm1974_vm11, %v5452_v33 }
 0x296   : > { %2668 = vmatpush.msrb.mxu2 %v2493_v10 }
 0x297   : > { %3091 = vmatpush.msk.msrb.mxu3 %vm1972_vm1, %v5452_v33 }
 0x298   : > { %2672 = vmatpush.msrb.mxu2 %v2499_v22 }
 0x299   : > { %3092 = vmatpush.msk.msrb.mxu3 %vm1970_vm2, %v5452_v33 }
 0x29a   : > { %2676 = vmatpush.msrb.mxu2 %v2505_v53 }
 0x29b   : > { %3093 = vmatpush.msk.msrb.mxu3 %vm5488_vm0, %v5452_v33 }
 0x29c   : > { %2680 = vmatpush.msrb.mxu2 %v2511_v27 }
 0x29d   : > { %3094 = vmatpush.msk.msrb.mxu3 %vm5489_vm7, %v5452_v33 }
 0x29e   : > { %2684 = vmatpush.msrb.mxu2 %v2517_v38 }
 0x29f   : > { %3095 = vmatpush.msk.msrb.mxu3 %vm1964_vm13, %v5452_v33 }
 0x2a0   : > { %2688 = vmatpush.msrb.mxu2 %v2523_v42 }
 0x2a1   : > { %3096 = vmatpush.msk.msrb.mxu3 %vm1962_vm14, %v5452_v33  ;;  %2690 = vmatmul.f32.vlgmr.msrb.gmra.mxu2 %v4765_v41 }
 0x2a3   : > { %3097 = vmatpush.msk.msrb.mxu3 %vm1960_vm4, %v5452_v33 }
 0x2a5   : > { %3098 = vmatpush.msk.msrb.mxu3 %vm1958_vm5, %v5452_v33 }
 0x2a7   : > { %3099 = vmatpush.msk.msrb.mxu3 %vm1956_vm15, %v5452_v33 }
 0x2a9   : > { %3100 = vmatpush.msk.msrb.mxu3 %vm1954_vm12, %v5452_v33 }
 0x2aa   : > { %2727 = vmatmul.f32.vlgmr.msrb.gmra.mxu3 %v4765_v41 }
 0x2ab   : > { %3195 = shalt.err (!%p3192_p5)
}
 0x2ac   : > { %3107 = dma.vmem_to_hbm [thread:$0]  (%p3326_p4), %s2812_s17, 32, %s2814_s18, %s2785_s19   ;;  %v2732_v6 = vld.sshfl [vmem:[#allocation1] sm:$0xff pattern:$0x75316420]  ;;  %vm5490_vm8 = vcmask 1043456   ;;  %v5494_v51 = vld [vmem:[#allocation5_spill] sm:$0xff] }
 0x2ad   : > { %v2733_v20 = vld.sshfl [vmem:[#allocation1 + $0x8] sm:$0xff pattern:$0x75316420]  ;;  %s5491_s0 = sshll.u32 %s3350_s15, 3  ;;  %vm5492_vm9 = vmmov %vm5490_vm8  ;;  %s2972_s30 = sshll.u32 %s3350_s15, 1 }
 0x2ae   : > { %s314_s28 = scalar_lea.vmem %s5330_s4, %s5491_s0  ;;  %vm5493_vm10 = vmmov %vm5490_vm8  ;;  %s324_s14 = scalar_lea.vmem %s5332_s6, %s2972_s30 }
 0x2af   : > { %v2188_v63 = vpop.f32.mrf.mxu1 }
 0x2b7   : > { %v2242_v23 = vpop.f32.mrf.mxu2  ;;  %v2387_v2 = vpop.f32.mrf.mxu1 }
 0x2ca   : > { %v2087_v45 = vpop.f32.mrf.mxu0 }
 0x2cb   : > { %v2189_v62 = vadd.f32 %v2188_v63, %v2087_v45 }
 0x2cc   : > { %v2281_v61 = vpop.f32.mrf.mxu3 }
 0x2cd   : > { %v2243_v14 = vadd.f32 %v2242_v23, %v2189_v62 }
 0x2cf   : > { %v2282_v17 = vadd.f32 %v2281_v61, %v2243_v14 }
 0x2d2   : > { %v2350_v16 = vpop.f32.mrf.mxu0 }
 0x2d3   : > { %v2351_v11 = vadd.f32 %v2350_v16, %v2282_v17 }
 0x2d5   : > { %v2388_v35 = vadd.f32 %v2387_v2, %v2351_v11 }
 0x2d7   : > { %v2736_v33 = vsub.f32 %v2388_v35, %v2732_v6 }
 0x2d9   : > { %v2753_v30 = vmul.f32 %v2736_v33, %v2736_v33 }
 0x2db   : > { %v2755_v54 = vsel %vm5490_vm8, %v2753_v30, 0.0 }
 0x2dc   : > { %v2756_v46 = vrot.slane %v2755_v54, 4 }
 0x2de   : > { %v2757_v39 = vadd.f32 %v2756_v46, %v2755_v54 }
 0x2e0   : > { %v2758_v26 = vrot.slane %v2757_v39, 2 }
 0x2e2   : > { %v2759_v37 = vadd.f32 %v2758_v26, %v2757_v39 }
 0x2e4   : > { %v2760_v60 = vrot.slane %v2759_v37, 1 }
 0x2e6   : > { %v2761_v22 = vadd.f32 %v2760_v60, %v2759_v37 }
 0x2ff   : > { %v2622_v31 = vpop.f32.mrf.mxu1 }
 0x301   : > { %v2583_v48 = vpop.f32.mrf.mxu0 }
 0x308   : > { %v2428_v18 = vpop.f32.mrf.mxu2 }
 0x30d   : > { %v2529_v55 = vpop.f32.mrf.mxu3 }
 0x30e   : > { %v2530_v15 = vadd.f32 %v2529_v55, %v2428_v18 }
 0x310   : > { %v2584_v41 = vadd.f32 %v2583_v48, %v2530_v15 }
 0x312   : > { %v2623_v57 = vadd.f32 %v2622_v31, %v2584_v41 }
 0x324   : > { %v2691_v50 = vpop.f32.mrf.mxu2 }
 0x325   : > { %v2692_v44 = vadd.f32 %v2691_v50, %v2623_v57 }
 0x32d   : > { %v2728_v40 = vpop.f32.mrf.mxu3 }
 0x32e   : > { %v2729_v28 = vadd.f32 %v2728_v40, %v2692_v44 }
 0x330   : > { %v2737_v52 = vsub.f32 %v2729_v28, %v2733_v20 }
 0x332   : > { %v2740_v34 = vrot.slane %v2737_v52, 4  ;;  %v2754_v1 = vmul.f32 %v2737_v52, %v2737_v52 }
 0x334   : > { %v2741_v58 = vsel %vm5492_vm9, %v2736_v33, %v2740_v34  ;;  %v2762_v13 = vsel %vm5493_vm10, %v2754_v1, 0.0 }
 0x335   : > { %v2743_v59 = vadd.f32 %v2741_v58, %v5494_v51  ;;  %v2763_v32 = vrot.slane %v2762_v13, 4 }
 0x337   : > { %2744 = vst [vmem:[%s314_s28] sm:$0xff] %v2743_v59  ;;  %v2764_v0 = vadd.f32 %v2763_v32, %v2762_v13 }
 0x339   : > { %v2765_v25 = vrot.slane %v2764_v0, 2 }
 0x33b   : > { %v2766_v43 = vadd.f32 %v2765_v25, %v2764_v0 }
 0x33d   : > { %v2767_v29 = vrot.slane %v2766_v43, 1 }
 0x33f   : > { %v2768_v10 = vadd.f32 %v2767_v29, %v2766_v43 }
 0x341   : > { %v2771_v19 = vrot.slane %v2768_v10, 7 }
 0x343   : > { %v2772_v53 = vsel %vm2746_vm6, %v2761_v22, %v2771_v19 }
 0x344   : > { %2774 = vst.msk [vmem:[%s324_s14] sm:$0x3] %vm5091_vm3, %v2772_v53 }
 0x345 PF: > { %p3113_p4 = scmp.ge.s32.totalorder %s3246_s26, 2  ;;  %s2841_s17 = sand.u32 1, %s3226_s21  }
 0x346   : > { %s2842_s15 = scalar_lea.sflag [#allocation3], %s2841_s17 }
 0x347   : > { %p3110_p6 = pnand %p3113_p4, %p3333_p8 }
 0x349   : > { %p3111_p7 = pneg %p3110_p6 }
 0x34b   : > { %3221 = dma.done.wait (%p3111_p7), %s2842_s15, 32  }
 0x34c   : > { %3223 = vsyncadd (%p3111_p7), %s2842_s15, 4294967264  ;;  %s20_s26 = sadd.s32 1, %s3246_s26   ;;  %s5495_s21 = smov %s3230_s22 }
 0x34d   : > { %p17_p9 = scmp.ge.s32.totalorder %s20_s26, 4   ;;  %s5496_s22 = smov %s3234_s23 }
 0x34e   : > { %s5497_s23 = smov %s3339_s10  ;;  %s5498_s24 = smov %s3242_s25 }
 0x34f   : > { %s5499_s25 = smov %s5501_s29  ;;  %19 = sbr.rel (!%p17_p9) target bundleno = 6 (0x6), region = 95 }
 0x354   :  { %2859 = vsyncpa [#allocation3], 1 }
 0x355   :  { %2861 = vsyncpa [#allocation3 + $0x1], 1 }

</bundles_post_ra>
